<compile_context>
chip_gen: v5e
topology: v5e:2x2
jax: 0.10.0
libtpu: 0.0.40
codegen_flags: <defaults>
</compile_context>

<pallas_src>
import functools

import jax
import jax.numpy as jnp
from jax.experimental import pallas as pl
from jax.experimental.pallas import tpu as pltpu


def _linear_kernel(x_ref, w_ref, b_ref, o_ref, *, k_total, tk, needs_mask):
    """One lane-dense K-chunk of out = x @ w.T + b.

    x_ref: (B, tk) VMEM, w_ref: (1, tk) VMEM, b_ref: (1,) SMEM,
    o_ref: (B, 1) f32 resident accumulator (same block every grid step).
    """
    p = pl.program_id(0)

    @pl.when(p == 0)
    def _():
        o_ref[...] = jnp.zeros_like(o_ref)

    prod = x_ref[...].astype(jnp.float32) * w_ref[...].astype(jnp.float32)
    if needs_mask:
        # The last chunk extends past K; that VMEM tail is undefined (possibly
        # NaN/Inf), so mask the product explicitly instead of relying on *0.
        col = jax.lax.broadcasted_iota(jnp.int32, prod.shape, dimension=1)
        prod = jnp.where(p * tk + col < k_total, prod, 0.0)

    o_ref[...] += jnp.sum(prod, axis=-1, keepdims=True)

    @pl.when(p == pl.num_programs(0) - 1)
    def _():
        o_ref[...] += b_ref[0]


def neural_net_forward(x, w, b, *, n_parts=1):
    """out = x @ w.T + b, matching torch.nn.Linear(K, 1).forward.

    x: (B, K), w: (1, K) (PyTorch layout), b: (1,).
    """
    B, K = x.shape
    assert w.shape == (1, K), w.shape

    # Lane-aligned chunking of the feature axis; x is never padded in HBM.
    lanes = pl.cdiv(K, 128)                 # number of 128-lane groups
    n_chunks = max(1, min(n_parts, lanes))
    tk = pl.cdiv(lanes, n_chunks) * 128     # chunk width (multiple of 128)
    n_chunks = pl.cdiv(K, tk)               # guarantee no fully-OOB chunk
    needs_mask = (K % tk) != 0

    b_smem = b.reshape(1).astype(jnp.float32)

    kernel = functools.partial(
        _linear_kernel, k_total=K, tk=tk, needs_mask=needs_mask)

    out = pl.pallas_call(
        kernel,
        out_shape=jax.ShapeDtypeStruct((B, 1), jnp.float32),
        grid_spec=pltpu.PrefetchScalarGridSpec(
            num_scalar_prefetch=0,
            grid=(n_chunks,),
            in_specs=[
                pl.BlockSpec((B, tk), lambda p: (0, p)),   # x chunk (lane dense)
                pl.BlockSpec((1, tk), lambda p: (0, p)),   # weight row chunk
                pl.BlockSpec(memory_space=pltpu.MemorySpace.SMEM),  # bias
            ],
            out_specs=pl.BlockSpec((B, 1), lambda p: (0, 0)),  # resident acc
        ),
        compiler_params=pltpu.CompilerParams(
            # The output block is reused (accumulated) across the grid axis,
            # so the reduction axis must be "arbitrary".
            dimension_semantics=("arbitrary",),
        ),
        cost_estimate=pl.CostEstimate(
            flops=2 * B * K,
            bytes_accessed=4 * (B * K + K + B + 1),
            transcendentals=0,
        ),
    )(x, w, b_smem)

    return out.astype(x.dtype)


if __name__ == "__main__":
    # Shapes implied by the module: input_size=57600, output_size=1.
    input_size = 57600
    output_size = 1
    batch = 8

    key = jax.random.PRNGKey(0)
    kx, kw, kb = jax.random.split(key, 3)

    # Deterministic synthetic parameters (mimic nn.Linear's uniform init bound).
    bound = 1.0 / (input_size ** 0.5)
    w = jax.random.uniform(kw, (output_size, input_size), jnp.float32, -bound, bound)
    b = jax.random.uniform(kb, (output_size,), jnp.float32, -bound, bound)
    x = jax.random.normal(kx, (batch, input_size), jnp.float32)

    out = neural_net_forward(x, w, b)
    out = jax.block_until_ready(out)

    ref = x @ w.T + b.reshape(1, 1)
    assert out.shape == (batch, output_size)
    assert jnp.allclose(out, ref, atol=1e-3, rtol=1e-3), (out, ref)

    # Secondary check: K not a multiple of 128 and n_parts=2 — exercises the
    # in-kernel tail masking and the multi-step accumulator + last-step bias.
    k2 = 300
    kx2, kw2, kb2 = jax.random.split(jax.random.PRNGKey(1), 3)
    w2 = jax.random.uniform(kw2, (1, k2), jnp.float32, -0.1, 0.1)
    b2 = jax.random.uniform(kb2, (1,), jnp.float32, -0.1, 0.1)
    x2 = jax.random.normal(kx2, (batch, k2), jnp.float32)
    out2 = jax.block_until_ready(neural_net_forward(x2, w2, b2, n_parts=2))
    ref2 = x2 @ w2.T + b2.reshape(1, 1)
    assert jnp.allclose(out2, ref2, atol=1e-3, rtol=1e-3), (out2, ref2)

    print("KERNEL_OK")
</pallas_src>

<mosaic_0001>
module attributes {stable_mosaic.version = 11 : i64} {
  func.func @_linear_kernel(%arg0: i32, %arg1: memref<8x57600xf32, #tpu.memory_space<vmem>>, %arg2: memref<1x57600xf32, #tpu.memory_space<vmem>>, %arg3: memref<1xf32, #tpu.memory_space<smem>>, %arg4: memref<8x1xf32, #tpu.memory_space<vmem>>) attributes {dimension_semantics = [#tpu.dimension_semantics<arbitrary>], iteration_bounds = array<i64: 1>, scalar_prefetch = 0 : i64, scratch_operands = 0 : i64, tpu.core_type = #tpu.core_type<tc>, window_params = [{transform_indices = @transform_0, window_bounds = array<i64: 8, 57600>}, {transform_indices = @transform_1, window_bounds = array<i64: 1, 57600>}, {transform_indices = @transform_2, window_bounds = array<i64: 1>}, {pipeline_mode = #tpu.pipeline_mode<synchronous>, transform_indices = @transform_3, window_bounds = array<i64: 8, 1>}]} {
    %c0_i32 = arith.constant 0 : i32
    %0 = arith.cmpi eq, %arg0, %c0_i32 : i32
    %1 = arith.extui %0 : i1 to i32
    %c0_i32_0 = arith.constant 0 : i32
    %2 = arith.cmpi ne, %1, %c0_i32_0 : i32
    scf.if %2 {
      %cst_10 = arith.constant 0.000000e+00 : f32
      %15 = vector.broadcast %cst_10 : f32 to vector<8x1xf32>
      %c0_11 = arith.constant 0 : index
      %c0_12 = arith.constant 0 : index
      %16 = vector.load %arg4[%c0_11, %c0_12] : memref<8x1xf32, #tpu.memory_space<vmem>>, vector<8x1xf32>
      tpu.vector_store %arg4[%c0_11, %c0_12], %15 {strides = array<i32>} : memref<8x1xf32, #tpu.memory_space<vmem>>, vector<8x1xf32>,
    } else {
    }
    %c0 = arith.constant 0 : index
    %c0_1 = arith.constant 0 : index
    %3 = vector.load %arg1[%c0, %c0_1] : memref<8x57600xf32, #tpu.memory_space<vmem>>, vector<8x57600xf32>
    %c0_2 = arith.constant 0 : index
    %c0_3 = arith.constant 0 : index
    %4 = vector.load %arg2[%c0_2, %c0_3] : memref<1x57600xf32, #tpu.memory_space<vmem>>, vector<1x57600xf32>
    %5 = vector.broadcast %4 : vector<1x57600xf32> to vector<8x57600xf32>
    %6 = arith.mulf %3, %5 : vector<8x57600xf32>
    %c0_4 = arith.constant 0 : index
    %c0_5 = arith.constant 0 : index
    %7 = vector.load %arg4[%c0_4, %c0_5] : memref<8x1xf32, #tpu.memory_space<vmem>>, vector<8x1xf32>
    %cst = arith.constant dense<0.000000e+00> : vector<8xf32>
    %8 = vector.multi_reduction <add>, %6, %cst [1] : vector<8x57600xf32> to vector<8xf32>
    %9 = vector.shape_cast %8 : vector<8xf32> to vector<8x1xf32>
    %10 = arith.addf %7, %9 : vector<8x1xf32>
    %c0_6 = arith.constant 0 : index
    %c0_7 = arith.constant 0 : index
    %11 = vector.load %arg4[%c0_6, %c0_7] : memref<8x1xf32, #tpu.memory_space<vmem>>, vector<8x1xf32>
    tpu.vector_store %arg4[%c0_6, %c0_7], %10 {strides = array<i32>} : memref<8x1xf32, #tpu.memory_space<vmem>>, vector<8x1xf32>,
    %c0_i32_8 = arith.constant 0 : i32
    %12 = arith.cmpi eq, %arg0, %c0_i32_8 : i32
    %13 = arith.extui %12 : i1 to i32
    %c0_i32_9 = arith.constant 0 : i32
    %14 = arith.cmpi ne, %13, %c0_i32_9 : i32
    scf.if %14 {
      %c0_10 = arith.constant 0 : index
      %c0_11 = arith.constant 0 : index
      %15 = vector.load %arg4[%c0_10, %c0_11] : memref<8x1xf32, #tpu.memory_space<vmem>>, vector<8x1xf32>
      %c0_12 = arith.constant 0 : index
      %16 = memref.load %arg3[%c0_12] : memref<1xf32, #tpu.memory_space<smem>>
      %17 = vector.broadcast %16 : f32 to vector<8x1xf32>
      %18 = arith.addf %15, %17 : vector<8x1xf32>
      %c0_13 = arith.constant 0 : index
      %c0_14 = arith.constant 0 : index
      %19 = vector.load %arg4[%c0_13, %c0_14] : memref<8x1xf32, #tpu.memory_space<vmem>>, vector<8x1xf32>
      tpu.vector_store %arg4[%c0_13, %c0_14], %18 {strides = array<i32>} : memref<8x1xf32, #tpu.memory_space<vmem>>, vector<8x1xf32>,
    } else {
    }
    return
  }
  func.func @transform_0(%arg0: i32) -> (i32, i32) {
    %c0_i32 = arith.constant 0 : i32
    %c0_i32_0 = arith.constant 0 : i32
    return %c0_i32, %arg0 : i32, i32
  }
  func.func @transform_1(%arg0: i32) -> (i32, i32) {
    %c0_i32 = arith.constant 0 : i32
    %c0_i32_0 = arith.constant 0 : i32
    return %c0_i32, %arg0 : i32, i32
  }
  func.func @transform_2(%arg0: i32) -> i32 {
    %c0_i32 = arith.constant 0 : i32
    %c0_i32_0 = arith.constant 0 : i32
    return %c0_i32 : i32
  }
  func.func @transform_3(%arg0: i32) -> (i32, i32) {
    %c0_i32 = arith.constant 0 : i32
    %c0_i32_0 = arith.constant 0 : i32
    %c0_i32_1 = arith.constant 0 : i32
    return %c0_i32, %c0_i32_0 : i32, i32
  }
}

</mosaic_0001>

<bundles_post_ra>
// kernel: tpu_custom_call.1
= control target key start
LH: loop header
LB: loop body
LE: loop exit
PB: predicated region body
PF: predicated region fallthrough
CT: control target
= control target key end

     0   :  { %9 = vsyncpa [#allocation4], 0  ;;  %s2537_s0 = inlined_call_operand.hbm [shape: f32[8,57600], index: 0, kind: input, shape index: {}]   ;;  %s2538_s1 = inlined_call_operand.hbm [shape: f32[1,57600], index: 1, kind: input, shape index: {}]   ;;  %s2539_s2 = inlined_call_operand.<no memory space> [shape: f32[1], index: 2, kind: input, shape index: {}]   ;;  %s2540_s3 = inlined_call_operand.vmem [shape: f32[8,1], index: 3, kind: output, shape index: {}]  }
   0x1   :  { %s16_s14 = sshll.u32 %s2537_s0, 4  ;;  %s17_s14 = int_to_ptr.hbm [resolvable:$true] %s16_s14 }
   0x2   :  { %10 = vsyncpa [#allocation6], 0  ;;  %s2487_s15 = smov [#allocation3]   ;;  %s27_s19 = sshll.u32 %s2538_s1, 4  ;;  %s28_s19 = int_to_ptr.hbm [resolvable:$true] %s27_s19 }
   0x3   :  { %s18_s16 = sshll.u32 %s2487_s15, 4  ;;  %s2488_s20 = smov [#allocation5]   ;;  %s19_s16 = int_to_ptr.vmem [resolvable:$true] %s18_s16 }
   0x4   :  { %21 = dma.hbm_to_vmem [thread:$0]  %s17_s14, 57600, %s19_s16, [#allocation4]  }
   0x5   :  { %s29_s21 = sshll.u32 %s2488_s20, 4  ;;  %s30_s21 = int_to_ptr.vmem [resolvable:$true] %s29_s21 }
   0x6   :  { %32 = dma.hbm_to_vmem [thread:$0]  %s28_s19, 7200, %s30_s21, [#allocation6]  }
   0x7   :  { %2483 = dma.done.wait [#allocation4], 57600  }
   0x8   :  { %2484 = vsyncadd [#allocation4], 4294909696 }
   0x9   :  { %2485 = dma.done.wait [#allocation6], 7200  }
   0xa   :  { %2486 = vsyncadd [#allocation6], 4294960096  ;;  %vm47_vm0 = vcmask 7168   ;;  %v2489_v0 = vmov 0.0   ;;  %v499_v1 = vld [vmem:[#allocation5] sm:$0xff]  ;;  %v49_v4 = vld [vmem:[#allocation3] sm:$0xff] }
   0xb   :  { %48 = vst.msk [vmem:[%s2540_s3] sm:$0xff] %vm47_vm0, %v2489_v0  ;;  %v613_v2 = vperm.slane %v499_v1, 0  ;;  %v614_v3 = vperm.slane %v499_v1, 1  ;;  %v50_v5 = vld [vmem:[#allocation3 + $0x8] sm:$0xff]  ;;  %v615_v6 = vperm.slane %v499_v1, 2  ;;  %v51_v7 = vld [vmem:[#allocation3 + $0x10] sm:$0xff] }
   0xc   :  { %v616_v8 = vperm.slane %v499_v1, 3  ;;  %v52_v11 = vld [vmem:[#allocation3 + $0x18] sm:$0xff]  ;;  %v617_v12 = vperm.slane %v499_v1, 4  ;;  %v53_v14 = vld [vmem:[#allocation3 + $0x20] sm:$0xff]  ;;  %v618_v15 = vperm.slane %v499_v1, 5  ;;  %v54_v18 = vld [vmem:[#allocation3 + $0x28] sm:$0xff] }
   0xd   :  { %v1513_v9 = vmul.f32 %v613_v2, %v49_v4  ;;  %v1514_v10 = vmul.f32 %v614_v3, %v50_v5  ;;  %v1515_v13 = vmul.f32 %v615_v6, %v51_v7  ;;  %v619_v19 = vperm.slane %v499_v1, 6  ;;  %v55_v22 = vld [vmem:[#allocation3 + $0x30] sm:$0xff]  ;;  %v500_v23 = vld [vmem:[#allocation5 + $0x8] sm:$0xff]  ;;  %v57_v31 = vld [vmem:[#allocation3 + $0x40] sm:$0xff] }
   0xe   :  { %v1516_v16 = vmul.f32 %v616_v8, %v52_v11  ;;  %v1517_v20 = vmul.f32 %v617_v12, %v53_v14  ;;  %v620_v24 = vperm.slane %v499_v1, 7  ;;  %v1518_v25 = vmul.f32 %v618_v15, %v54_v18  ;;  %v56_v27 = vld [vmem:[#allocation3 + $0x38] sm:$0xff]  ;;  %v58_v35 = vld [vmem:[#allocation3 + $0x48] sm:$0xff]  ;;  %v59_v39 = vld [vmem:[#allocation3 + $0x50] sm:$0xff] }
   0xf   :  { %v1964_v17 = vadd.f32 %v1514_v10, %v1513_v9  ;;  %v621_v28 = vperm.slane %v500_v23, 0  ;;  %v1519_v29 = vmul.f32 %v619_v19, %v55_v22  ;;  %v622_v32 = vperm.slane %v500_v23, 1  ;;  %v60_v43 = vld [vmem:[#allocation3 + $0x58] sm:$0xff]  ;;  %v61_v47 = vld [vmem:[#allocation3 + $0x60] sm:$0xff]  ;;  %v62_v51 = vld [vmem:[#allocation3 + $0x68] sm:$0xff] }
  0x10   :  { %v1520_v33 = vmul.f32 %v620_v24, %v56_v27  ;;  %v623_v36 = vperm.slane %v500_v23, 2  ;;  %v624_v40 = vperm.slane %v500_v23, 3  ;;  %v625_v44 = vperm.slane %v500_v23, 4  ;;  %v63_v55 = vld [vmem:[#allocation3 + $0x70] sm:$0xff]  ;;  %v501_v56 = vld [vmem:[#allocation5 + $0x10] sm:$0xff]  ;;  %v64_v60 = vld [vmem:[#allocation3 + $0x78] sm:$0xff] }
  0x11   :  { %v1965_v21 = vadd.f32 %v1964_v17, %v1515_v13  ;;  %v1521_v37 = vmul.f32 %v621_v28, %v57_v31  ;;  %v1522_v41 = vmul.f32 %v622_v32, %v58_v35  ;;  %v626_v48 = vperm.slane %v500_v23, 5  ;;  %v65_v0 = vld [vmem:[#allocation3 + $0x80] sm:$0xff]  ;;  %v66_v4 = vld [vmem:[#allocation3 + $0x88] sm:$0xff]  ;;  %v67_v8 = vld [vmem:[#allocation3 + $0x90] sm:$0xff] }
  0x12   :  { %v1523_v45 = vmul.f32 %v623_v36, %v59_v39  ;;  %v1524_v49 = vmul.f32 %v624_v40, %v60_v43  ;;  %v627_v52 = vperm.slane %v500_v23, 6  ;;  %v1525_v53 = vmul.f32 %v625_v44, %v61_v47  ;;  %v68_v12 = vld [vmem:[#allocation3 + $0x98] sm:$0xff]  ;;  %v71_v24 = vld [vmem:[#allocation3 + $0xb0] sm:$0xff] }
  0x13   :  { %v1966_v26 = vadd.f32 %v1965_v21, %v1516_v16  ;;  %v628_v57 = vperm.slane %v500_v23, 7  ;;  %v1526_v58 = vmul.f32 %v626_v48, %v62_v51  ;;  %v629_v61 = vperm.slane %v501_v56, 0  ;;  %v69_v16 = vld [vmem:[#allocation3 + $0xa0] sm:$0xff] }
  0x14   :  { %v1527_v62 = vmul.f32 %v627_v52, %v63_v55  ;;  %v630_v1 = vperm.slane %v501_v56, 1  ;;  %v631_v5 = vperm.slane %v501_v56, 2  ;;  %v632_v9 = vperm.slane %v501_v56, 3 }
  0x15   :  { %v1967_v30 = vadd.f32 %v1966_v26, %v1517_v20  ;;  %v1528_v2 = vmul.f32 %v628_v57, %v64_v60  ;;  %v1529_v6 = vmul.f32 %v629_v61, %v65_v0  ;;  %v633_v13 = vperm.slane %v501_v56, 4  ;;  %v70_v20 = vld [vmem:[#allocation3 + $0xa8] sm:$0xff]  ;;  %v79_v57 = vld [vmem:[#allocation3 + $0xf0] sm:$0xff] }
  0x16   :  { %v1530_v10 = vmul.f32 %v630_v1, %v66_v4  ;;  %v1531_v14 = vmul.f32 %v631_v5, %v67_v8  ;;  %v634_v17 = vperm.slane %v501_v56, 5  ;;  %v1532_v18 = vmul.f32 %v632_v9, %v68_v12 }
  0x17   :  { %v1968_v34 = vadd.f32 %v1967_v30, %v1518_v25  ;;  %v635_v21 = vperm.slane %v501_v56, 6  ;;  %v1533_v22 = vmul.f32 %v633_v13, %v69_v16  ;;  %v502_v25 = vld [vmem:[#allocation5 + $0x18] sm:$0xff]  ;;  %v636_v26 = vperm.slane %v501_v56, 7 }
  0x18   :  { %v1534_v27 = vmul.f32 %v634_v17, %v70_v20  ;;  %v637_v30 = vperm.slane %v502_v25, 0 }
  0x19   :  { %v1969_v38 = vadd.f32 %v1968_v34, %v1519_v29  ;;  %v72_v29 = vld [vmem:[#allocation3 + $0xb8] sm:$0xff]  ;;  %v1535_v31 = vmul.f32 %v635_v21, %v71_v24  ;;  %v638_v34 = vperm.slane %v502_v25, 1 }
  0x1a   :  { %v1536_v35 = vmul.f32 %v636_v26, %v72_v29  ;;  %v87_v26 = vld [vmem:[#allocation3 + $0x130] sm:$0xff] }
  0x1b   :  { %v1970_v42 = vadd.f32 %v1969_v38, %v1520_v33  ;;  %v73_v33 = vld [vmem:[#allocation3 + $0xc0] sm:$0xff]  ;;  %v639_v38 = vperm.slane %v502_v25, 2 }
  0x1c   :  { %v1537_v39 = vmul.f32 %v637_v30, %v73_v33 }
  0x1d   :  { %v1971_v46 = vadd.f32 %v1970_v42, %v1521_v37  ;;  %v74_v37 = vld [vmem:[#allocation3 + $0xc8] sm:$0xff]  ;;  %v640_v42 = vperm.slane %v502_v25, 3 }
  0x1e   :  { %v1538_v43 = vmul.f32 %v638_v34, %v74_v37 }
  0x1f   :  { %v1972_v50 = vadd.f32 %v1971_v46, %v1522_v41  ;;  %v75_v41 = vld [vmem:[#allocation3 + $0xd0] sm:$0xff]  ;;  %v641_v46 = vperm.slane %v502_v25, 4 }
  0x20   :  { %v1539_v47 = vmul.f32 %v639_v38, %v75_v41 }
  0x21   :  { %v1973_v54 = vadd.f32 %v1972_v50, %v1523_v45  ;;  %v76_v45 = vld [vmem:[#allocation3 + $0xd8] sm:$0xff]  ;;  %v642_v50 = vperm.slane %v502_v25, 5 }
  0x22   :  { %v1540_v51 = vmul.f32 %v640_v42, %v76_v45 }
  0x23   :  { %v1974_v59 = vadd.f32 %v1973_v54, %v1524_v49  ;;  %v77_v49 = vld [vmem:[#allocation3 + $0xe0] sm:$0xff]  ;;  %v643_v54 = vperm.slane %v502_v25, 6 }
  0x24   :  { %v1541_v55 = vmul.f32 %v641_v46, %v77_v49 }
  0x25   :  { %v1975_v63 = vadd.f32 %v1974_v59, %v1525_v53  ;;  %v78_v53 = vld [vmem:[#allocation3 + $0xe8] sm:$0xff]  ;;  %v644_v59 = vperm.slane %v502_v25, 7  ;;  %v1543_v0 = vmul.f32 %v643_v54, %v79_v57 }
  0x26   :  { %v1542_v60 = vmul.f32 %v642_v50, %v78_v53 }
  0x27   :  { %v1976_v3 = vadd.f32 %v1975_v63, %v1526_v58  ;;  %v503_v58 = vld [vmem:[#allocation5 + $0x20] sm:$0xff] }
  0x28   :  { %v645_v63 = vperm.slane %v503_v58, 0 }
  0x29   :  { %v1977_v7 = vadd.f32 %v1976_v3, %v1527_v62  ;;  %v80_v62 = vld [vmem:[#allocation3 + $0xf8] sm:$0xff]  ;;  %v646_v3 = vperm.slane %v503_v58, 1 }
  0x2a   :  { %v1544_v4 = vmul.f32 %v644_v59, %v80_v62  ;;  %v95_v59 = vld [vmem:[#allocation3 + $0x170] sm:$0xff] }
  0x2b   :  { %v1978_v11 = vadd.f32 %v1977_v7, %v1528_v2  ;;  %v81_v2 = vld [vmem:[#allocation3 + $0x100] sm:$0xff]  ;;  %v647_v7 = vperm.slane %v503_v58, 2 }
  0x2c   :  { %v1545_v8 = vmul.f32 %v645_v63, %v81_v2 }
  0x2d   :  { %v1979_v15 = vadd.f32 %v1978_v11, %v1529_v6  ;;  %v82_v6 = vld [vmem:[#allocation3 + $0x108] sm:$0xff]  ;;  %v648_v11 = vperm.slane %v503_v58, 3 }
  0x2e   :  { %v1546_v12 = vmul.f32 %v646_v3, %v82_v6 }
  0x2f   :  { %v1980_v19 = vadd.f32 %v1979_v15, %v1530_v10  ;;  %v83_v10 = vld [vmem:[#allocation3 + $0x110] sm:$0xff]  ;;  %v649_v15 = vperm.slane %v503_v58, 4 }
  0x30   :  { %v1547_v16 = vmul.f32 %v647_v7, %v83_v10 }
  0x31   :  { %v1981_v23 = vadd.f32 %v1980_v19, %v1531_v14  ;;  %v84_v14 = vld [vmem:[#allocation3 + $0x118] sm:$0xff]  ;;  %v650_v19 = vperm.slane %v503_v58, 5 }
  0x32   :  { %v1548_v20 = vmul.f32 %v648_v11, %v84_v14 }
  0x33   :  { %v1982_v28 = vadd.f32 %v1981_v23, %v1532_v18  ;;  %v85_v18 = vld [vmem:[#allocation3 + $0x120] sm:$0xff]  ;;  %v651_v23 = vperm.slane %v503_v58, 6 }
  0x34   :  { %v1549_v24 = vmul.f32 %v649_v15, %v85_v18 }
  0x35   :  { %v1983_v32 = vadd.f32 %v1982_v28, %v1533_v22  ;;  %v86_v22 = vld [vmem:[#allocation3 + $0x128] sm:$0xff]  ;;  %v652_v28 = vperm.slane %v503_v58, 7  ;;  %v1551_v33 = vmul.f32 %v651_v23, %v87_v26 }
  0x36   :  { %v1550_v29 = vmul.f32 %v650_v19, %v86_v22 }
  0x37   :  { %v1984_v36 = vadd.f32 %v1983_v32, %v1534_v27  ;;  %v504_v27 = vld [vmem:[#allocation5 + $0x28] sm:$0xff] }
  0x38   :  { %v653_v32 = vperm.slane %v504_v27, 0 }
  0x39   :  { %v1985_v40 = vadd.f32 %v1984_v36, %v1535_v31  ;;  %v88_v31 = vld [vmem:[#allocation3 + $0x138] sm:$0xff]  ;;  %v654_v36 = vperm.slane %v504_v27, 1 }
  0x3a   :  { %v1552_v37 = vmul.f32 %v652_v28, %v88_v31  ;;  %v103_v28 = vld [vmem:[#allocation3 + $0x1b0] sm:$0xff] }
  0x3b   :  { %v1986_v44 = vadd.f32 %v1985_v40, %v1536_v35  ;;  %v89_v35 = vld [vmem:[#allocation3 + $0x140] sm:$0xff]  ;;  %v655_v40 = vperm.slane %v504_v27, 2 }
  0x3c   :  { %v1553_v41 = vmul.f32 %v653_v32, %v89_v35 }
  0x3d   :  { %v1987_v48 = vadd.f32 %v1986_v44, %v1537_v39  ;;  %v90_v39 = vld [vmem:[#allocation3 + $0x148] sm:$0xff]  ;;  %v656_v44 = vperm.slane %v504_v27, 3 }
  0x3e   :  { %v1554_v45 = vmul.f32 %v654_v36, %v90_v39 }
  0x3f   :  { %v1988_v52 = vadd.f32 %v1987_v48, %v1538_v43  ;;  %v91_v43 = vld [vmem:[#allocation3 + $0x150] sm:$0xff]  ;;  %v657_v48 = vperm.slane %v504_v27, 4 }
  0x40   :  { %v1555_v49 = vmul.f32 %v655_v40, %v91_v43 }
  0x41   :  { %v1989_v56 = vadd.f32 %v1988_v52, %v1539_v47  ;;  %v92_v47 = vld [vmem:[#allocation3 + $0x158] sm:$0xff]  ;;  %v658_v52 = vperm.slane %v504_v27, 5 }
  0x42   :  { %v1556_v53 = vmul.f32 %v656_v44, %v92_v47 }
  0x43   :  { %v1990_v61 = vadd.f32 %v1989_v56, %v1540_v51  ;;  %v93_v51 = vld [vmem:[#allocation3 + $0x160] sm:$0xff]  ;;  %v659_v56 = vperm.slane %v504_v27, 6 }
  0x44   :  { %v1557_v57 = vmul.f32 %v657_v48, %v93_v51 }
  0x45   :  { %v1991_v1 = vadd.f32 %v1990_v61, %v1541_v55  ;;  %v94_v55 = vld [vmem:[#allocation3 + $0x168] sm:$0xff]  ;;  %v660_v61 = vperm.slane %v504_v27, 7  ;;  %v1559_v2 = vmul.f32 %v659_v56, %v95_v59 }
  0x46   :  { %v1558_v62 = vmul.f32 %v658_v52, %v94_v55 }
  0x47   :  { %v1992_v5 = vadd.f32 %v1991_v1, %v1542_v60  ;;  %v505_v60 = vld [vmem:[#allocation5 + $0x30] sm:$0xff] }
  0x48   :  { %v661_v1 = vperm.slane %v505_v60, 0 }
  0x49   :  { %v1993_v9 = vadd.f32 %v1992_v5, %v1543_v0  ;;  %v96_v0 = vld [vmem:[#allocation3 + $0x178] sm:$0xff]  ;;  %v662_v5 = vperm.slane %v505_v60, 1 }
  0x4a   :  { %v1560_v6 = vmul.f32 %v660_v61, %v96_v0  ;;  %v111_v61 = vld [vmem:[#allocation3 + $0x1f0] sm:$0xff] }
  0x4b   :  { %v1994_v13 = vadd.f32 %v1993_v9, %v1544_v4  ;;  %v97_v4 = vld [vmem:[#allocation3 + $0x180] sm:$0xff]  ;;  %v663_v9 = vperm.slane %v505_v60, 2 }
  0x4c   :  { %v1561_v10 = vmul.f32 %v661_v1, %v97_v4 }
  0x4d   :  { %v1995_v17 = vadd.f32 %v1994_v13, %v1545_v8  ;;  %v98_v8 = vld [vmem:[#allocation3 + $0x188] sm:$0xff]  ;;  %v664_v13 = vperm.slane %v505_v60, 3 }
  0x4e   :  { %v1562_v14 = vmul.f32 %v662_v5, %v98_v8 }
  0x4f   :  { %v1996_v21 = vadd.f32 %v1995_v17, %v1546_v12  ;;  %v99_v12 = vld [vmem:[#allocation3 + $0x190] sm:$0xff]  ;;  %v665_v17 = vperm.slane %v505_v60, 4 }
  0x50   :  { %v1563_v18 = vmul.f32 %v663_v9, %v99_v12 }
  0x51   :  { %v1997_v25 = vadd.f32 %v1996_v21, %v1547_v16  ;;  %v100_v16 = vld [vmem:[#allocation3 + $0x198] sm:$0xff]  ;;  %v666_v21 = vperm.slane %v505_v60, 5 }
  0x52   :  { %v1564_v22 = vmul.f32 %v664_v13, %v100_v16 }
  0x53   :  { %v1998_v30 = vadd.f32 %v1997_v25, %v1548_v20  ;;  %v101_v20 = vld [vmem:[#allocation3 + $0x1a0] sm:$0xff]  ;;  %v667_v25 = vperm.slane %v505_v60, 6 }
  0x54   :  { %v1565_v26 = vmul.f32 %v665_v17, %v101_v20 }
  0x55   :  { %v1999_v34 = vadd.f32 %v1998_v30, %v1549_v24  ;;  %v102_v24 = vld [vmem:[#allocation3 + $0x1a8] sm:$0xff]  ;;  %v668_v30 = vperm.slane %v505_v60, 7  ;;  %v1567_v35 = vmul.f32 %v667_v25, %v103_v28 }
  0x56   :  { %v1566_v31 = vmul.f32 %v666_v21, %v102_v24 }
  0x57   :  { %v2000_v38 = vadd.f32 %v1999_v34, %v1550_v29  ;;  %v506_v29 = vld [vmem:[#allocation5 + $0x38] sm:$0xff] }
  0x58   :  { %v669_v34 = vperm.slane %v506_v29, 0 }
  0x59   :  { %v2001_v42 = vadd.f32 %v2000_v38, %v1551_v33  ;;  %v104_v33 = vld [vmem:[#allocation3 + $0x1b8] sm:$0xff]  ;;  %v670_v38 = vperm.slane %v506_v29, 1 }
  0x5a   :  { %v1568_v39 = vmul.f32 %v668_v30, %v104_v33  ;;  %v119_v30 = vld [vmem:[#allocation3 + $0x230] sm:$0xff] }
  0x5b   :  { %v2002_v46 = vadd.f32 %v2001_v42, %v1552_v37  ;;  %v105_v37 = vld [vmem:[#allocation3 + $0x1c0] sm:$0xff]  ;;  %v671_v42 = vperm.slane %v506_v29, 2 }
  0x5c   :  { %v1569_v43 = vmul.f32 %v669_v34, %v105_v37 }
  0x5d   :  { %v2003_v50 = vadd.f32 %v2002_v46, %v1553_v41  ;;  %v106_v41 = vld [vmem:[#allocation3 + $0x1c8] sm:$0xff]  ;;  %v672_v46 = vperm.slane %v506_v29, 3 }
  0x5e   :  { %v1570_v47 = vmul.f32 %v670_v38, %v106_v41 }
  0x5f   :  { %v2004_v54 = vadd.f32 %v2003_v50, %v1554_v45  ;;  %v107_v45 = vld [vmem:[#allocation3 + $0x1d0] sm:$0xff]  ;;  %v673_v50 = vperm.slane %v506_v29, 4 }
  0x60   :  { %v1571_v51 = vmul.f32 %v671_v42, %v107_v45 }
  0x61   :  { %v2005_v58 = vadd.f32 %v2004_v54, %v1555_v49  ;;  %v108_v49 = vld [vmem:[#allocation3 + $0x1d8] sm:$0xff]  ;;  %v674_v54 = vperm.slane %v506_v29, 5 }
  0x62   :  { %v1572_v55 = vmul.f32 %v672_v46, %v108_v49 }
  0x63   :  { %v2006_v63 = vadd.f32 %v2005_v58, %v1556_v53  ;;  %v109_v53 = vld [vmem:[#allocation3 + $0x1e0] sm:$0xff]  ;;  %v675_v58 = vperm.slane %v506_v29, 6 }
  0x64   :  { %v1573_v59 = vmul.f32 %v673_v50, %v109_v53 }
  0x65   :  { %v2007_v3 = vadd.f32 %v2006_v63, %v1557_v57  ;;  %v110_v57 = vld [vmem:[#allocation3 + $0x1e8] sm:$0xff]  ;;  %v676_v63 = vperm.slane %v506_v29, 7  ;;  %v1575_v4 = vmul.f32 %v675_v58, %v111_v61 }
  0x66   :  { %v1574_v0 = vmul.f32 %v674_v54, %v110_v57 }
  0x67   :  { %v2008_v7 = vadd.f32 %v2007_v3, %v1558_v62  ;;  %v507_v62 = vld [vmem:[#allocation5 + $0x40] sm:$0xff] }
  0x68   :  { %v677_v3 = vperm.slane %v507_v62, 0 }
  0x69   :  { %v2009_v11 = vadd.f32 %v2008_v7, %v1559_v2  ;;  %v112_v2 = vld [vmem:[#allocation3 + $0x1f8] sm:$0xff]  ;;  %v678_v7 = vperm.slane %v507_v62, 1 }
  0x6a   :  { %v1576_v8 = vmul.f32 %v676_v63, %v112_v2  ;;  %v127_v63 = vld [vmem:[#allocation3 + $0x270] sm:$0xff] }
  0x6b   :  { %v2010_v15 = vadd.f32 %v2009_v11, %v1560_v6  ;;  %v113_v6 = vld [vmem:[#allocation3 + $0x200] sm:$0xff]  ;;  %v679_v11 = vperm.slane %v507_v62, 2 }
  0x6c   :  { %v1577_v12 = vmul.f32 %v677_v3, %v113_v6 }
  0x6d   :  { %v2011_v19 = vadd.f32 %v2010_v15, %v1561_v10  ;;  %v114_v10 = vld [vmem:[#allocation3 + $0x208] sm:$0xff]  ;;  %v680_v15 = vperm.slane %v507_v62, 3 }
  0x6e   :  { %v1578_v16 = vmul.f32 %v678_v7, %v114_v10 }
  0x6f   :  { %v2012_v23 = vadd.f32 %v2011_v19, %v1562_v14  ;;  %v115_v14 = vld [vmem:[#allocation3 + $0x210] sm:$0xff]  ;;  %v681_v19 = vperm.slane %v507_v62, 4 }
  0x70   :  { %v1579_v20 = vmul.f32 %v679_v11, %v115_v14 }
  0x71   :  { %v2013_v27 = vadd.f32 %v2012_v23, %v1563_v18  ;;  %v116_v18 = vld [vmem:[#allocation3 + $0x218] sm:$0xff]  ;;  %v682_v23 = vperm.slane %v507_v62, 5 }
  0x72   :  { %v1580_v24 = vmul.f32 %v680_v15, %v116_v18 }
  0x73   :  { %v2014_v32 = vadd.f32 %v2013_v27, %v1564_v22  ;;  %v117_v22 = vld [vmem:[#allocation3 + $0x220] sm:$0xff]  ;;  %v683_v27 = vperm.slane %v507_v62, 6 }
  0x74   :  { %v1581_v28 = vmul.f32 %v681_v19, %v117_v22 }
  0x75   :  { %v2015_v36 = vadd.f32 %v2014_v32, %v1565_v26  ;;  %v118_v26 = vld [vmem:[#allocation3 + $0x228] sm:$0xff]  ;;  %v684_v32 = vperm.slane %v507_v62, 7  ;;  %v1583_v37 = vmul.f32 %v683_v27, %v119_v30 }
  0x76   :  { %v1582_v33 = vmul.f32 %v682_v23, %v118_v26 }
  0x77   :  { %v2016_v40 = vadd.f32 %v2015_v36, %v1566_v31  ;;  %v508_v31 = vld [vmem:[#allocation5 + $0x48] sm:$0xff] }
  0x78   :  { %v685_v36 = vperm.slane %v508_v31, 0 }
  0x79   :  { %v2017_v44 = vadd.f32 %v2016_v40, %v1567_v35  ;;  %v120_v35 = vld [vmem:[#allocation3 + $0x238] sm:$0xff]  ;;  %v686_v40 = vperm.slane %v508_v31, 1 }
  0x7a   :  { %v1584_v41 = vmul.f32 %v684_v32, %v120_v35  ;;  %v135_v32 = vld [vmem:[#allocation3 + $0x2b0] sm:$0xff] }
  0x7b   :  { %v2018_v48 = vadd.f32 %v2017_v44, %v1568_v39  ;;  %v121_v39 = vld [vmem:[#allocation3 + $0x240] sm:$0xff]  ;;  %v687_v44 = vperm.slane %v508_v31, 2 }
  0x7c   :  { %v1585_v45 = vmul.f32 %v685_v36, %v121_v39 }
  0x7d   :  { %v2019_v52 = vadd.f32 %v2018_v48, %v1569_v43  ;;  %v122_v43 = vld [vmem:[#allocation3 + $0x248] sm:$0xff]  ;;  %v688_v48 = vperm.slane %v508_v31, 3 }
  0x7e   :  { %v1586_v49 = vmul.f32 %v686_v40, %v122_v43 }
  0x7f   :  { %v2020_v56 = vadd.f32 %v2019_v52, %v1570_v47  ;;  %v123_v47 = vld [vmem:[#allocation3 + $0x250] sm:$0xff]  ;;  %v689_v52 = vperm.slane %v508_v31, 4 }
  0x80   :  { %v1587_v53 = vmul.f32 %v687_v44, %v123_v47 }
  0x81   :  { %v2021_v60 = vadd.f32 %v2020_v56, %v1571_v51  ;;  %v124_v51 = vld [vmem:[#allocation3 + $0x258] sm:$0xff]  ;;  %v690_v56 = vperm.slane %v508_v31, 5 }
  0x82   :  { %v1588_v57 = vmul.f32 %v688_v48, %v124_v51 }
  0x83   :  { %v2022_v1 = vadd.f32 %v2021_v60, %v1572_v55  ;;  %v125_v55 = vld [vmem:[#allocation3 + $0x260] sm:$0xff]  ;;  %v691_v60 = vperm.slane %v508_v31, 6 }
  0x84   :  { %v1589_v61 = vmul.f32 %v689_v52, %v125_v55 }
  0x85   :  { %v2023_v5 = vadd.f32 %v2022_v1, %v1573_v59  ;;  %v126_v59 = vld [vmem:[#allocation3 + $0x268] sm:$0xff]  ;;  %v692_v1 = vperm.slane %v508_v31, 7  ;;  %v1591_v6 = vmul.f32 %v691_v60, %v127_v63 }
  0x86   :  { %v1590_v2 = vmul.f32 %v690_v56, %v126_v59 }
  0x87   :  { %v2024_v9 = vadd.f32 %v2023_v5, %v1574_v0  ;;  %v509_v0 = vld [vmem:[#allocation5 + $0x50] sm:$0xff] }
  0x88   :  { %v693_v5 = vperm.slane %v509_v0, 0 }
  0x89   :  { %v2025_v13 = vadd.f32 %v2024_v9, %v1575_v4  ;;  %v128_v4 = vld [vmem:[#allocation3 + $0x278] sm:$0xff]  ;;  %v694_v9 = vperm.slane %v509_v0, 1 }
  0x8a   :  { %v1592_v10 = vmul.f32 %v692_v1, %v128_v4  ;;  %v143_v1 = vld [vmem:[#allocation3 + $0x2f0] sm:$0xff] }
  0x8b   :  { %v2026_v17 = vadd.f32 %v2025_v13, %v1576_v8  ;;  %v129_v8 = vld [vmem:[#allocation3 + $0x280] sm:$0xff]  ;;  %v695_v13 = vperm.slane %v509_v0, 2 }
  0x8c   :  { %v1593_v14 = vmul.f32 %v693_v5, %v129_v8 }
  0x8d   :  { %v2027_v21 = vadd.f32 %v2026_v17, %v1577_v12  ;;  %v130_v12 = vld [vmem:[#allocation3 + $0x288] sm:$0xff]  ;;  %v696_v17 = vperm.slane %v509_v0, 3 }
  0x8e   :  { %v1594_v18 = vmul.f32 %v694_v9, %v130_v12 }
  0x8f   :  { %v2028_v25 = vadd.f32 %v2027_v21, %v1578_v16  ;;  %v131_v16 = vld [vmem:[#allocation3 + $0x290] sm:$0xff]  ;;  %v697_v21 = vperm.slane %v509_v0, 4 }
  0x90   :  { %v1595_v22 = vmul.f32 %v695_v13, %v131_v16 }
  0x91   :  { %v2029_v29 = vadd.f32 %v2028_v25, %v1579_v20  ;;  %v132_v20 = vld [vmem:[#allocation3 + $0x298] sm:$0xff]  ;;  %v698_v25 = vperm.slane %v509_v0, 5 }
  0x92   :  { %v1596_v26 = vmul.f32 %v696_v17, %v132_v20 }
  0x93   :  { %v2030_v34 = vadd.f32 %v2029_v29, %v1580_v24  ;;  %v133_v24 = vld [vmem:[#allocation3 + $0x2a0] sm:$0xff]  ;;  %v699_v29 = vperm.slane %v509_v0, 6 }
  0x94   :  { %v1597_v30 = vmul.f32 %v697_v21, %v133_v24 }
  0x95   :  { %v2031_v38 = vadd.f32 %v2030_v34, %v1581_v28  ;;  %v134_v28 = vld [vmem:[#allocation3 + $0x2a8] sm:$0xff]  ;;  %v700_v34 = vperm.slane %v509_v0, 7  ;;  %v1599_v39 = vmul.f32 %v699_v29, %v135_v32 }
  0x96   :  { %v1598_v35 = vmul.f32 %v698_v25, %v134_v28 }
  0x97   :  { %v2032_v42 = vadd.f32 %v2031_v38, %v1582_v33  ;;  %v510_v33 = vld [vmem:[#allocation5 + $0x58] sm:$0xff] }
  0x98   :  { %v701_v38 = vperm.slane %v510_v33, 0 }
  0x99   :  { %v2033_v46 = vadd.f32 %v2032_v42, %v1583_v37  ;;  %v136_v37 = vld [vmem:[#allocation3 + $0x2b8] sm:$0xff]  ;;  %v702_v42 = vperm.slane %v510_v33, 1 }
  0x9a   :  { %v1600_v43 = vmul.f32 %v700_v34, %v136_v37  ;;  %v151_v34 = vld [vmem:[#allocation3 + $0x330] sm:$0xff] }
  0x9b   :  { %v2034_v50 = vadd.f32 %v2033_v46, %v1584_v41  ;;  %v137_v41 = vld [vmem:[#allocation3 + $0x2c0] sm:$0xff]  ;;  %v703_v46 = vperm.slane %v510_v33, 2 }
  0x9c   :  { %v1601_v47 = vmul.f32 %v701_v38, %v137_v41 }
  0x9d   :  { %v2035_v54 = vadd.f32 %v2034_v50, %v1585_v45  ;;  %v138_v45 = vld [vmem:[#allocation3 + $0x2c8] sm:$0xff]  ;;  %v704_v50 = vperm.slane %v510_v33, 3 }
  0x9e   :  { %v1602_v51 = vmul.f32 %v702_v42, %v138_v45 }
  0x9f   :  { %v2036_v58 = vadd.f32 %v2035_v54, %v1586_v49  ;;  %v139_v49 = vld [vmem:[#allocation3 + $0x2d0] sm:$0xff]  ;;  %v705_v54 = vperm.slane %v510_v33, 4 }
  0xa0   :  { %v1603_v55 = vmul.f32 %v703_v46, %v139_v49 }
  0xa1   :  { %v2037_v62 = vadd.f32 %v2036_v58, %v1587_v53  ;;  %v140_v53 = vld [vmem:[#allocation3 + $0x2d8] sm:$0xff]  ;;  %v706_v58 = vperm.slane %v510_v33, 5 }
  0xa2   :  { %v1604_v59 = vmul.f32 %v704_v50, %v140_v53 }
  0xa3   :  { %v2038_v3 = vadd.f32 %v2037_v62, %v1588_v57  ;;  %v141_v57 = vld [vmem:[#allocation3 + $0x2e0] sm:$0xff]  ;;  %v707_v62 = vperm.slane %v510_v33, 6 }
  0xa4   :  { %v1605_v63 = vmul.f32 %v705_v54, %v141_v57 }
  0xa5   :  { %v2039_v7 = vadd.f32 %v2038_v3, %v1589_v61  ;;  %v142_v61 = vld [vmem:[#allocation3 + $0x2e8] sm:$0xff]  ;;  %v708_v3 = vperm.slane %v510_v33, 7  ;;  %v1607_v8 = vmul.f32 %v707_v62, %v143_v1 }
  0xa6   :  { %v1606_v4 = vmul.f32 %v706_v58, %v142_v61 }
  0xa7   :  { %v2040_v11 = vadd.f32 %v2039_v7, %v1590_v2  ;;  %v511_v2 = vld [vmem:[#allocation5 + $0x60] sm:$0xff] }
  0xa8   :  { %v709_v7 = vperm.slane %v511_v2, 0 }
  0xa9   :  { %v2041_v15 = vadd.f32 %v2040_v11, %v1591_v6  ;;  %v144_v6 = vld [vmem:[#allocation3 + $0x2f8] sm:$0xff]  ;;  %v710_v11 = vperm.slane %v511_v2, 1 }
  0xaa   :  { %v1608_v12 = vmul.f32 %v708_v3, %v144_v6  ;;  %v159_v3 = vld [vmem:[#allocation3 + $0x370] sm:$0xff] }
  0xab   :  { %v2042_v19 = vadd.f32 %v2041_v15, %v1592_v10  ;;  %v145_v10 = vld [vmem:[#allocation3 + $0x300] sm:$0xff]  ;;  %v711_v15 = vperm.slane %v511_v2, 2 }
  0xac   :  { %v1609_v16 = vmul.f32 %v709_v7, %v145_v10 }
  0xad   :  { %v2043_v23 = vadd.f32 %v2042_v19, %v1593_v14  ;;  %v146_v14 = vld [vmem:[#allocation3 + $0x308] sm:$0xff]  ;;  %v712_v19 = vperm.slane %v511_v2, 3 }
  0xae   :  { %v1610_v20 = vmul.f32 %v710_v11, %v146_v14 }
  0xaf   :  { %v2044_v27 = vadd.f32 %v2043_v23, %v1594_v18  ;;  %v147_v18 = vld [vmem:[#allocation3 + $0x310] sm:$0xff]  ;;  %v713_v23 = vperm.slane %v511_v2, 4 }
  0xb0   :  { %v1611_v24 = vmul.f32 %v711_v15, %v147_v18 }
  0xb1   :  { %v2045_v31 = vadd.f32 %v2044_v27, %v1595_v22  ;;  %v148_v22 = vld [vmem:[#allocation3 + $0x318] sm:$0xff]  ;;  %v714_v27 = vperm.slane %v511_v2, 5 }
  0xb2   :  { %v1612_v28 = vmul.f32 %v712_v19, %v148_v22 }
  0xb3   :  { %v2046_v36 = vadd.f32 %v2045_v31, %v1596_v26  ;;  %v149_v26 = vld [vmem:[#allocation3 + $0x320] sm:$0xff]  ;;  %v715_v31 = vperm.slane %v511_v2, 6 }
  0xb4   :  { %v1613_v32 = vmul.f32 %v713_v23, %v149_v26 }
  0xb5   :  { %v2047_v40 = vadd.f32 %v2046_v36, %v1597_v30  ;;  %v150_v30 = vld [vmem:[#allocation3 + $0x328] sm:$0xff]  ;;  %v716_v36 = vperm.slane %v511_v2, 7  ;;  %v1615_v41 = vmul.f32 %v715_v31, %v151_v34 }
  0xb6   :  { %v1614_v37 = vmul.f32 %v714_v27, %v150_v30 }
  0xb7   :  { %v2048_v44 = vadd.f32 %v2047_v40, %v1598_v35  ;;  %v512_v35 = vld [vmem:[#allocation5 + $0x68] sm:$0xff] }
  0xb8   :  { %v717_v40 = vperm.slane %v512_v35, 0 }
  0xb9   :  { %v2049_v48 = vadd.f32 %v2048_v44, %v1599_v39  ;;  %v152_v39 = vld [vmem:[#allocation3 + $0x338] sm:$0xff]  ;;  %v718_v44 = vperm.slane %v512_v35, 1 }
  0xba   :  { %v1616_v45 = vmul.f32 %v716_v36, %v152_v39  ;;  %v167_v36 = vld [vmem:[#allocation3 + $0x3b0] sm:$0xff] }
  0xbb   :  { %v2050_v52 = vadd.f32 %v2049_v48, %v1600_v43  ;;  %v153_v43 = vld [vmem:[#allocation3 + $0x340] sm:$0xff]  ;;  %v719_v48 = vperm.slane %v512_v35, 2 }
  0xbc   :  { %v1617_v49 = vmul.f32 %v717_v40, %v153_v43 }
  0xbd   :  { %v2051_v56 = vadd.f32 %v2050_v52, %v1601_v47  ;;  %v154_v47 = vld [vmem:[#allocation3 + $0x348] sm:$0xff]  ;;  %v720_v52 = vperm.slane %v512_v35, 3 }
  0xbe   :  { %v1618_v53 = vmul.f32 %v718_v44, %v154_v47 }
  0xbf   :  { %v2052_v60 = vadd.f32 %v2051_v56, %v1602_v51  ;;  %v155_v51 = vld [vmem:[#allocation3 + $0x350] sm:$0xff]  ;;  %v721_v56 = vperm.slane %v512_v35, 4 }
  0xc0   :  { %v1619_v57 = vmul.f32 %v719_v48, %v155_v51 }
  0xc1   :  { %v2053_v0 = vadd.f32 %v2052_v60, %v1603_v55  ;;  %v156_v55 = vld [vmem:[#allocation3 + $0x358] sm:$0xff]  ;;  %v722_v60 = vperm.slane %v512_v35, 5 }
  0xc2   :  { %v1620_v61 = vmul.f32 %v720_v52, %v156_v55 }
  0xc3   :  { %v2054_v5 = vadd.f32 %v2053_v0, %v1604_v59  ;;  %v157_v59 = vld [vmem:[#allocation3 + $0x360] sm:$0xff]  ;;  %v723_v0 = vperm.slane %v512_v35, 6 }
  0xc4   :  { %v1621_v1 = vmul.f32 %v721_v56, %v157_v59 }
  0xc5   :  { %v2055_v9 = vadd.f32 %v2054_v5, %v1605_v63  ;;  %v158_v63 = vld [vmem:[#allocation3 + $0x368] sm:$0xff]  ;;  %v724_v5 = vperm.slane %v512_v35, 7  ;;  %v1623_v10 = vmul.f32 %v723_v0, %v159_v3 }
  0xc6   :  { %v1622_v6 = vmul.f32 %v722_v60, %v158_v63 }
  0xc7   :  { %v2056_v13 = vadd.f32 %v2055_v9, %v1606_v4  ;;  %v513_v4 = vld [vmem:[#allocation5 + $0x70] sm:$0xff] }
  0xc8   :  { %v725_v9 = vperm.slane %v513_v4, 0 }
  0xc9   :  { %v2057_v17 = vadd.f32 %v2056_v13, %v1607_v8  ;;  %v160_v8 = vld [vmem:[#allocation3 + $0x378] sm:$0xff]  ;;  %v726_v13 = vperm.slane %v513_v4, 1 }
  0xca   :  { %v1624_v14 = vmul.f32 %v724_v5, %v160_v8  ;;  %v175_v5 = vld [vmem:[#allocation3 + $0x3f0] sm:$0xff] }
  0xcb   :  { %v2058_v21 = vadd.f32 %v2057_v17, %v1608_v12  ;;  %v161_v12 = vld [vmem:[#allocation3 + $0x380] sm:$0xff]  ;;  %v727_v17 = vperm.slane %v513_v4, 2 }
  0xcc   :  { %v1625_v18 = vmul.f32 %v725_v9, %v161_v12 }
  0xcd   :  { %v2059_v25 = vadd.f32 %v2058_v21, %v1609_v16  ;;  %v162_v16 = vld [vmem:[#allocation3 + $0x388] sm:$0xff]  ;;  %v728_v21 = vperm.slane %v513_v4, 3 }
  0xce   :  { %v1626_v22 = vmul.f32 %v726_v13, %v162_v16 }
  0xcf   :  { %v2060_v29 = vadd.f32 %v2059_v25, %v1610_v20  ;;  %v163_v20 = vld [vmem:[#allocation3 + $0x390] sm:$0xff]  ;;  %v729_v25 = vperm.slane %v513_v4, 4 }
  0xd0   :  { %v1627_v26 = vmul.f32 %v727_v17, %v163_v20 }
  0xd1   :  { %v2061_v33 = vadd.f32 %v2060_v29, %v1611_v24  ;;  %v164_v24 = vld [vmem:[#allocation3 + $0x398] sm:$0xff]  ;;  %v730_v29 = vperm.slane %v513_v4, 5 }
  0xd2   :  { %v1628_v30 = vmul.f32 %v728_v21, %v164_v24 }
  0xd3   :  { %v2062_v38 = vadd.f32 %v2061_v33, %v1612_v28  ;;  %v165_v28 = vld [vmem:[#allocation3 + $0x3a0] sm:$0xff]  ;;  %v731_v33 = vperm.slane %v513_v4, 6 }
  0xd4   :  { %v1629_v34 = vmul.f32 %v729_v25, %v165_v28 }
  0xd5   :  { %v2063_v42 = vadd.f32 %v2062_v38, %v1613_v32  ;;  %v166_v32 = vld [vmem:[#allocation3 + $0x3a8] sm:$0xff]  ;;  %v732_v38 = vperm.slane %v513_v4, 7  ;;  %v1631_v43 = vmul.f32 %v731_v33, %v167_v36 }
  0xd6   :  { %v1630_v39 = vmul.f32 %v730_v29, %v166_v32 }
  0xd7   :  { %v2064_v46 = vadd.f32 %v2063_v42, %v1614_v37  ;;  %v514_v37 = vld [vmem:[#allocation5 + $0x78] sm:$0xff] }
  0xd8   :  { %v733_v42 = vperm.slane %v514_v37, 0 }
  0xd9   :  { %v2065_v50 = vadd.f32 %v2064_v46, %v1615_v41  ;;  %v168_v41 = vld [vmem:[#allocation3 + $0x3b8] sm:$0xff]  ;;  %v734_v46 = vperm.slane %v514_v37, 1 }
  0xda   :  { %v1632_v47 = vmul.f32 %v732_v38, %v168_v41  ;;  %v183_v38 = vld [vmem:[#allocation3 + $0x430] sm:$0xff] }
  0xdb   :  { %v2066_v54 = vadd.f32 %v2065_v50, %v1616_v45  ;;  %v169_v45 = vld [vmem:[#allocation3 + $0x3c0] sm:$0xff]  ;;  %v735_v50 = vperm.slane %v514_v37, 2 }
  0xdc   :  { %v1633_v51 = vmul.f32 %v733_v42, %v169_v45 }
  0xdd   :  { %v2067_v58 = vadd.f32 %v2066_v54, %v1617_v49  ;;  %v170_v49 = vld [vmem:[#allocation3 + $0x3c8] sm:$0xff]  ;;  %v736_v54 = vperm.slane %v514_v37, 3 }
  0xde   :  { %v1634_v55 = vmul.f32 %v734_v46, %v170_v49 }
  0xdf   :  { %v2068_v62 = vadd.f32 %v2067_v58, %v1618_v53  ;;  %v171_v53 = vld [vmem:[#allocation3 + $0x3d0] sm:$0xff]  ;;  %v737_v58 = vperm.slane %v514_v37, 4 }
  0xe0   :  { %v1635_v59 = vmul.f32 %v735_v50, %v171_v53 }
  0xe1   :  { %v2069_v2 = vadd.f32 %v2068_v62, %v1619_v57  ;;  %v172_v57 = vld [vmem:[#allocation3 + $0x3d8] sm:$0xff]  ;;  %v738_v62 = vperm.slane %v514_v37, 5 }
  0xe2   :  { %v1636_v63 = vmul.f32 %v736_v54, %v172_v57 }
  0xe3   :  { %v2070_v7 = vadd.f32 %v2069_v2, %v1620_v61  ;;  %v173_v61 = vld [vmem:[#allocation3 + $0x3e0] sm:$0xff]  ;;  %v739_v2 = vperm.slane %v514_v37, 6 }
  0xe4   :  { %v1637_v3 = vmul.f32 %v737_v58, %v173_v61 }
  0xe5   :  { %v2071_v11 = vadd.f32 %v2070_v7, %v1621_v1  ;;  %v174_v1 = vld [vmem:[#allocation3 + $0x3e8] sm:$0xff]  ;;  %v740_v7 = vperm.slane %v514_v37, 7  ;;  %v1639_v12 = vmul.f32 %v739_v2, %v175_v5 }
  0xe6   :  { %v1638_v8 = vmul.f32 %v738_v62, %v174_v1 }
  0xe7   :  { %v2072_v15 = vadd.f32 %v2071_v11, %v1622_v6  ;;  %v515_v6 = vld [vmem:[#allocation5 + $0x80] sm:$0xff] }
  0xe8   :  { %v741_v11 = vperm.slane %v515_v6, 0 }
  0xe9   :  { %v2073_v19 = vadd.f32 %v2072_v15, %v1623_v10  ;;  %v176_v10 = vld [vmem:[#allocation3 + $0x3f8] sm:$0xff]  ;;  %v742_v15 = vperm.slane %v515_v6, 1 }
  0xea   :  { %v1640_v16 = vmul.f32 %v740_v7, %v176_v10  ;;  %v191_v7 = vld [vmem:[#allocation3 + $0x470] sm:$0xff] }
  0xeb   :  { %v2074_v23 = vadd.f32 %v2073_v19, %v1624_v14  ;;  %v177_v14 = vld [vmem:[#allocation3 + $0x400] sm:$0xff]  ;;  %v743_v19 = vperm.slane %v515_v6, 2 }
  0xec   :  { %v1641_v20 = vmul.f32 %v741_v11, %v177_v14 }
  0xed   :  { %v2075_v27 = vadd.f32 %v2074_v23, %v1625_v18  ;;  %v178_v18 = vld [vmem:[#allocation3 + $0x408] sm:$0xff]  ;;  %v744_v23 = vperm.slane %v515_v6, 3 }
  0xee   :  { %v1642_v24 = vmul.f32 %v742_v15, %v178_v18 }
  0xef   :  { %v2076_v31 = vadd.f32 %v2075_v27, %v1626_v22  ;;  %v179_v22 = vld [vmem:[#allocation3 + $0x410] sm:$0xff]  ;;  %v745_v27 = vperm.slane %v515_v6, 4 }
  0xf0   :  { %v1643_v28 = vmul.f32 %v743_v19, %v179_v22 }
  0xf1   :  { %v2077_v35 = vadd.f32 %v2076_v31, %v1627_v26  ;;  %v180_v26 = vld [vmem:[#allocation3 + $0x418] sm:$0xff]  ;;  %v746_v31 = vperm.slane %v515_v6, 5 }
  0xf2   :  { %v1644_v32 = vmul.f32 %v744_v23, %v180_v26 }
  0xf3   :  { %v2078_v40 = vadd.f32 %v2077_v35, %v1628_v30  ;;  %v181_v30 = vld [vmem:[#allocation3 + $0x420] sm:$0xff]  ;;  %v747_v35 = vperm.slane %v515_v6, 6 }
  0xf4   :  { %v1645_v36 = vmul.f32 %v745_v27, %v181_v30 }
  0xf5   :  { %v2079_v44 = vadd.f32 %v2078_v40, %v1629_v34  ;;  %v182_v34 = vld [vmem:[#allocation3 + $0x428] sm:$0xff]  ;;  %v748_v40 = vperm.slane %v515_v6, 7  ;;  %v1647_v45 = vmul.f32 %v747_v35, %v183_v38 }
  0xf6   :  { %v1646_v41 = vmul.f32 %v746_v31, %v182_v34 }
  0xf7   :  { %v2080_v48 = vadd.f32 %v2079_v44, %v1630_v39  ;;  %v516_v39 = vld [vmem:[#allocation5 + $0x88] sm:$0xff] }
  0xf8   :  { %v749_v44 = vperm.slane %v516_v39, 0 }
  0xf9   :  { %v2081_v52 = vadd.f32 %v2080_v48, %v1631_v43  ;;  %v184_v43 = vld [vmem:[#allocation3 + $0x438] sm:$0xff]  ;;  %v750_v48 = vperm.slane %v516_v39, 1 }
  0xfa   :  { %v1648_v49 = vmul.f32 %v748_v40, %v184_v43  ;;  %v199_v40 = vld [vmem:[#allocation3 + $0x4b0] sm:$0xff] }
  0xfb   :  { %v2082_v56 = vadd.f32 %v2081_v52, %v1632_v47  ;;  %v185_v47 = vld [vmem:[#allocation3 + $0x440] sm:$0xff]  ;;  %v751_v52 = vperm.slane %v516_v39, 2 }
  0xfc   :  { %v1649_v53 = vmul.f32 %v749_v44, %v185_v47 }
  0xfd   :  { %v2083_v60 = vadd.f32 %v2082_v56, %v1633_v51  ;;  %v186_v51 = vld [vmem:[#allocation3 + $0x448] sm:$0xff]  ;;  %v752_v56 = vperm.slane %v516_v39, 3 }
  0xfe   :  { %v1650_v57 = vmul.f32 %v750_v48, %v186_v51 }
  0xff   :  { %v2084_v0 = vadd.f32 %v2083_v60, %v1634_v55  ;;  %v187_v55 = vld [vmem:[#allocation3 + $0x450] sm:$0xff]  ;;  %v753_v60 = vperm.slane %v516_v39, 4 }
 0x100   :  { %v1651_v61 = vmul.f32 %v751_v52, %v187_v55 }
 0x101   :  { %v2085_v4 = vadd.f32 %v2084_v0, %v1635_v59  ;;  %v188_v59 = vld [vmem:[#allocation3 + $0x458] sm:$0xff]  ;;  %v754_v0 = vperm.slane %v516_v39, 5 }
 0x102   :  { %v1652_v1 = vmul.f32 %v752_v56, %v188_v59 }
 0x103   :  { %v2086_v9 = vadd.f32 %v2085_v4, %v1636_v63  ;;  %v189_v63 = vld [vmem:[#allocation3 + $0x460] sm:$0xff]  ;;  %v755_v4 = vperm.slane %v516_v39, 6 }
 0x104   :  { %v1653_v5 = vmul.f32 %v753_v60, %v189_v63 }
 0x105   :  { %v2087_v13 = vadd.f32 %v2086_v9, %v1637_v3  ;;  %v190_v3 = vld [vmem:[#allocation3 + $0x468] sm:$0xff]  ;;  %v756_v9 = vperm.slane %v516_v39, 7  ;;  %v1655_v14 = vmul.f32 %v755_v4, %v191_v7 }
 0x106   :  { %v1654_v10 = vmul.f32 %v754_v0, %v190_v3 }
 0x107   :  { %v2088_v17 = vadd.f32 %v2087_v13, %v1638_v8  ;;  %v517_v8 = vld [vmem:[#allocation5 + $0x90] sm:$0xff] }
 0x108   :  { %v757_v13 = vperm.slane %v517_v8, 0 }
 0x109   :  { %v2089_v21 = vadd.f32 %v2088_v17, %v1639_v12  ;;  %v192_v12 = vld [vmem:[#allocation3 + $0x478] sm:$0xff]  ;;  %v758_v17 = vperm.slane %v517_v8, 1 }
 0x10a   :  { %v1656_v18 = vmul.f32 %v756_v9, %v192_v12  ;;  %v207_v9 = vld [vmem:[#allocation3 + $0x4f0] sm:$0xff] }
 0x10b   :  { %v2090_v25 = vadd.f32 %v2089_v21, %v1640_v16  ;;  %v193_v16 = vld [vmem:[#allocation3 + $0x480] sm:$0xff]  ;;  %v759_v21 = vperm.slane %v517_v8, 2 }
 0x10c   :  { %v1657_v22 = vmul.f32 %v757_v13, %v193_v16 }
 0x10d   :  { %v2091_v29 = vadd.f32 %v2090_v25, %v1641_v20  ;;  %v194_v20 = vld [vmem:[#allocation3 + $0x488] sm:$0xff]  ;;  %v760_v25 = vperm.slane %v517_v8, 3 }
 0x10e   :  { %v1658_v26 = vmul.f32 %v758_v17, %v194_v20 }
 0x10f   :  { %v2092_v33 = vadd.f32 %v2091_v29, %v1642_v24  ;;  %v195_v24 = vld [vmem:[#allocation3 + $0x490] sm:$0xff]  ;;  %v761_v29 = vperm.slane %v517_v8, 4 }
 0x110   :  { %v1659_v30 = vmul.f32 %v759_v21, %v195_v24 }
 0x111   :  { %v2093_v37 = vadd.f32 %v2092_v33, %v1643_v28  ;;  %v196_v28 = vld [vmem:[#allocation3 + $0x498] sm:$0xff]  ;;  %v762_v33 = vperm.slane %v517_v8, 5 }
 0x112   :  { %v1660_v34 = vmul.f32 %v760_v25, %v196_v28 }
 0x113   :  { %v2094_v42 = vadd.f32 %v2093_v37, %v1644_v32  ;;  %v197_v32 = vld [vmem:[#allocation3 + $0x4a0] sm:$0xff]  ;;  %v763_v37 = vperm.slane %v517_v8, 6 }
 0x114   :  { %v1661_v38 = vmul.f32 %v761_v29, %v197_v32 }
 0x115   :  { %v2095_v46 = vadd.f32 %v2094_v42, %v1645_v36  ;;  %v198_v36 = vld [vmem:[#allocation3 + $0x4a8] sm:$0xff]  ;;  %v764_v42 = vperm.slane %v517_v8, 7  ;;  %v1663_v47 = vmul.f32 %v763_v37, %v199_v40 }
 0x116   :  { %v1662_v43 = vmul.f32 %v762_v33, %v198_v36 }
 0x117   :  { %v2096_v50 = vadd.f32 %v2095_v46, %v1646_v41  ;;  %v518_v41 = vld [vmem:[#allocation5 + $0x98] sm:$0xff] }
 0x118   :  { %v765_v46 = vperm.slane %v518_v41, 0 }
 0x119   :  { %v2097_v54 = vadd.f32 %v2096_v50, %v1647_v45  ;;  %v200_v45 = vld [vmem:[#allocation3 + $0x4b8] sm:$0xff]  ;;  %v766_v50 = vperm.slane %v518_v41, 1 }
 0x11a   :  { %v1664_v51 = vmul.f32 %v764_v42, %v200_v45  ;;  %v215_v42 = vld [vmem:[#allocation3 + $0x530] sm:$0xff] }
 0x11b   :  { %v2098_v58 = vadd.f32 %v2097_v54, %v1648_v49  ;;  %v201_v49 = vld [vmem:[#allocation3 + $0x4c0] sm:$0xff]  ;;  %v767_v54 = vperm.slane %v518_v41, 2 }
 0x11c   :  { %v1665_v55 = vmul.f32 %v765_v46, %v201_v49 }
 0x11d   :  { %v2099_v62 = vadd.f32 %v2098_v58, %v1649_v53  ;;  %v202_v53 = vld [vmem:[#allocation3 + $0x4c8] sm:$0xff]  ;;  %v768_v58 = vperm.slane %v518_v41, 3 }
 0x11e   :  { %v1666_v59 = vmul.f32 %v766_v50, %v202_v53 }
 0x11f   :  { %v2100_v2 = vadd.f32 %v2099_v62, %v1650_v57  ;;  %v203_v57 = vld [vmem:[#allocation3 + $0x4d0] sm:$0xff]  ;;  %v769_v62 = vperm.slane %v518_v41, 4 }
 0x120   :  { %v1667_v63 = vmul.f32 %v767_v54, %v203_v57 }
 0x121   :  { %v2101_v6 = vadd.f32 %v2100_v2, %v1651_v61  ;;  %v204_v61 = vld [vmem:[#allocation3 + $0x4d8] sm:$0xff]  ;;  %v770_v2 = vperm.slane %v518_v41, 5 }
 0x122   :  { %v1668_v3 = vmul.f32 %v768_v58, %v204_v61 }
 0x123   :  { %v2102_v11 = vadd.f32 %v2101_v6, %v1652_v1  ;;  %v205_v1 = vld [vmem:[#allocation3 + $0x4e0] sm:$0xff]  ;;  %v771_v6 = vperm.slane %v518_v41, 6 }
 0x124   :  { %v1669_v7 = vmul.f32 %v769_v62, %v205_v1 }
 0x125   :  { %v2103_v15 = vadd.f32 %v2102_v11, %v1653_v5  ;;  %v206_v5 = vld [vmem:[#allocation3 + $0x4e8] sm:$0xff]  ;;  %v772_v11 = vperm.slane %v518_v41, 7  ;;  %v1671_v16 = vmul.f32 %v771_v6, %v207_v9 }
 0x126   :  { %v1670_v12 = vmul.f32 %v770_v2, %v206_v5 }
 0x127   :  { %v2104_v19 = vadd.f32 %v2103_v15, %v1654_v10  ;;  %v519_v10 = vld [vmem:[#allocation5 + $0xa0] sm:$0xff] }
 0x128   :  { %v773_v15 = vperm.slane %v519_v10, 0 }
 0x129   :  { %v2105_v23 = vadd.f32 %v2104_v19, %v1655_v14  ;;  %v208_v14 = vld [vmem:[#allocation3 + $0x4f8] sm:$0xff]  ;;  %v774_v19 = vperm.slane %v519_v10, 1 }
 0x12a   :  { %v1672_v20 = vmul.f32 %v772_v11, %v208_v14  ;;  %v223_v11 = vld [vmem:[#allocation3 + $0x570] sm:$0xff] }
 0x12b   :  { %v2106_v27 = vadd.f32 %v2105_v23, %v1656_v18  ;;  %v209_v18 = vld [vmem:[#allocation3 + $0x500] sm:$0xff]  ;;  %v775_v23 = vperm.slane %v519_v10, 2 }
 0x12c   :  { %v1673_v24 = vmul.f32 %v773_v15, %v209_v18 }
 0x12d   :  { %v2107_v31 = vadd.f32 %v2106_v27, %v1657_v22  ;;  %v210_v22 = vld [vmem:[#allocation3 + $0x508] sm:$0xff]  ;;  %v776_v27 = vperm.slane %v519_v10, 3 }
 0x12e   :  { %v1674_v28 = vmul.f32 %v774_v19, %v210_v22 }
 0x12f   :  { %v2108_v35 = vadd.f32 %v2107_v31, %v1658_v26  ;;  %v211_v26 = vld [vmem:[#allocation3 + $0x510] sm:$0xff]  ;;  %v777_v31 = vperm.slane %v519_v10, 4 }
 0x130   :  { %v1675_v32 = vmul.f32 %v775_v23, %v211_v26 }
 0x131   :  { %v2109_v39 = vadd.f32 %v2108_v35, %v1659_v30  ;;  %v212_v30 = vld [vmem:[#allocation3 + $0x518] sm:$0xff]  ;;  %v778_v35 = vperm.slane %v519_v10, 5 }
 0x132   :  { %v1676_v36 = vmul.f32 %v776_v27, %v212_v30 }
 0x133   :  { %v2110_v44 = vadd.f32 %v2109_v39, %v1660_v34  ;;  %v213_v34 = vld [vmem:[#allocation3 + $0x520] sm:$0xff]  ;;  %v779_v39 = vperm.slane %v519_v10, 6 }
 0x134   :  { %v1677_v40 = vmul.f32 %v777_v31, %v213_v34 }
 0x135   :  { %v2111_v48 = vadd.f32 %v2110_v44, %v1661_v38  ;;  %v214_v38 = vld [vmem:[#allocation3 + $0x528] sm:$0xff]  ;;  %v780_v44 = vperm.slane %v519_v10, 7  ;;  %v1679_v49 = vmul.f32 %v779_v39, %v215_v42 }
 0x136   :  { %v1678_v45 = vmul.f32 %v778_v35, %v214_v38 }
 0x137   :  { %v2112_v52 = vadd.f32 %v2111_v48, %v1662_v43  ;;  %v520_v43 = vld [vmem:[#allocation5 + $0xa8] sm:$0xff] }
 0x138   :  { %v781_v48 = vperm.slane %v520_v43, 0 }
 0x139   :  { %v2113_v56 = vadd.f32 %v2112_v52, %v1663_v47  ;;  %v216_v47 = vld [vmem:[#allocation3 + $0x538] sm:$0xff]  ;;  %v782_v52 = vperm.slane %v520_v43, 1 }
 0x13a   :  { %v1680_v53 = vmul.f32 %v780_v44, %v216_v47  ;;  %v231_v44 = vld [vmem:[#allocation3 + $0x5b0] sm:$0xff] }
 0x13b   :  { %v2114_v60 = vadd.f32 %v2113_v56, %v1664_v51  ;;  %v217_v51 = vld [vmem:[#allocation3 + $0x540] sm:$0xff]  ;;  %v783_v56 = vperm.slane %v520_v43, 2 }
 0x13c   :  { %v1681_v57 = vmul.f32 %v781_v48, %v217_v51 }
 0x13d   :  { %v2115_v0 = vadd.f32 %v2114_v60, %v1665_v55  ;;  %v218_v55 = vld [vmem:[#allocation3 + $0x548] sm:$0xff]  ;;  %v784_v60 = vperm.slane %v520_v43, 3 }
 0x13e   :  { %v1682_v61 = vmul.f32 %v782_v52, %v218_v55 }
 0x13f   :  { %v2116_v4 = vadd.f32 %v2115_v0, %v1666_v59  ;;  %v219_v59 = vld [vmem:[#allocation3 + $0x550] sm:$0xff]  ;;  %v785_v0 = vperm.slane %v520_v43, 4 }
 0x140   :  { %v1683_v1 = vmul.f32 %v783_v56, %v219_v59 }
 0x141   :  { %v2117_v8 = vadd.f32 %v2116_v4, %v1667_v63  ;;  %v220_v63 = vld [vmem:[#allocation3 + $0x558] sm:$0xff]  ;;  %v786_v4 = vperm.slane %v520_v43, 5 }
 0x142   :  { %v1684_v5 = vmul.f32 %v784_v60, %v220_v63 }
 0x143   :  { %v2118_v13 = vadd.f32 %v2117_v8, %v1668_v3  ;;  %v221_v3 = vld [vmem:[#allocation3 + $0x560] sm:$0xff]  ;;  %v787_v8 = vperm.slane %v520_v43, 6 }
 0x144   :  { %v1685_v9 = vmul.f32 %v785_v0, %v221_v3 }
 0x145   :  { %v2119_v17 = vadd.f32 %v2118_v13, %v1669_v7  ;;  %v222_v7 = vld [vmem:[#allocation3 + $0x568] sm:$0xff]  ;;  %v788_v13 = vperm.slane %v520_v43, 7  ;;  %v1687_v18 = vmul.f32 %v787_v8, %v223_v11 }
 0x146   :  { %v1686_v14 = vmul.f32 %v786_v4, %v222_v7 }
 0x147   :  { %v2120_v21 = vadd.f32 %v2119_v17, %v1670_v12  ;;  %v521_v12 = vld [vmem:[#allocation5 + $0xb0] sm:$0xff] }
 0x148   :  { %v789_v17 = vperm.slane %v521_v12, 0 }
 0x149   :  { %v2121_v25 = vadd.f32 %v2120_v21, %v1671_v16  ;;  %v224_v16 = vld [vmem:[#allocation3 + $0x578] sm:$0xff]  ;;  %v790_v21 = vperm.slane %v521_v12, 1 }
 0x14a   :  { %v1688_v22 = vmul.f32 %v788_v13, %v224_v16  ;;  %v239_v13 = vld [vmem:[#allocation3 + $0x5f0] sm:$0xff] }
 0x14b   :  { %v2122_v29 = vadd.f32 %v2121_v25, %v1672_v20  ;;  %v225_v20 = vld [vmem:[#allocation3 + $0x580] sm:$0xff]  ;;  %v791_v25 = vperm.slane %v521_v12, 2 }
 0x14c   :  { %v1689_v26 = vmul.f32 %v789_v17, %v225_v20 }
 0x14d   :  { %v2123_v33 = vadd.f32 %v2122_v29, %v1673_v24  ;;  %v226_v24 = vld [vmem:[#allocation3 + $0x588] sm:$0xff]  ;;  %v792_v29 = vperm.slane %v521_v12, 3 }
 0x14e   :  { %v1690_v30 = vmul.f32 %v790_v21, %v226_v24 }
 0x14f   :  { %v2124_v37 = vadd.f32 %v2123_v33, %v1674_v28  ;;  %v227_v28 = vld [vmem:[#allocation3 + $0x590] sm:$0xff]  ;;  %v793_v33 = vperm.slane %v521_v12, 4 }
 0x150   :  { %v1691_v34 = vmul.f32 %v791_v25, %v227_v28 }
 0x151   :  { %v2125_v41 = vadd.f32 %v2124_v37, %v1675_v32  ;;  %v228_v32 = vld [vmem:[#allocation3 + $0x598] sm:$0xff]  ;;  %v794_v37 = vperm.slane %v521_v12, 5 }
 0x152   :  { %v1692_v38 = vmul.f32 %v792_v29, %v228_v32 }
 0x153   :  { %v2126_v46 = vadd.f32 %v2125_v41, %v1676_v36  ;;  %v229_v36 = vld [vmem:[#allocation3 + $0x5a0] sm:$0xff]  ;;  %v795_v41 = vperm.slane %v521_v12, 6 }
 0x154   :  { %v1693_v42 = vmul.f32 %v793_v33, %v229_v36 }
 0x155   :  { %v2127_v50 = vadd.f32 %v2126_v46, %v1677_v40  ;;  %v230_v40 = vld [vmem:[#allocation3 + $0x5a8] sm:$0xff]  ;;  %v796_v46 = vperm.slane %v521_v12, 7  ;;  %v1695_v51 = vmul.f32 %v795_v41, %v231_v44 }
 0x156   :  { %v1694_v47 = vmul.f32 %v794_v37, %v230_v40 }
 0x157   :  { %v2128_v54 = vadd.f32 %v2127_v50, %v1678_v45  ;;  %v522_v45 = vld [vmem:[#allocation5 + $0xb8] sm:$0xff] }
 0x158   :  { %v797_v50 = vperm.slane %v522_v45, 0 }
 0x159   :  { %v2129_v58 = vadd.f32 %v2128_v54, %v1679_v49  ;;  %v232_v49 = vld [vmem:[#allocation3 + $0x5b8] sm:$0xff]  ;;  %v798_v54 = vperm.slane %v522_v45, 1 }
 0x15a   :  { %v1696_v55 = vmul.f32 %v796_v46, %v232_v49  ;;  %v247_v46 = vld [vmem:[#allocation3 + $0x630] sm:$0xff] }
 0x15b   :  { %v2130_v62 = vadd.f32 %v2129_v58, %v1680_v53  ;;  %v233_v53 = vld [vmem:[#allocation3 + $0x5c0] sm:$0xff]  ;;  %v799_v58 = vperm.slane %v522_v45, 2 }
 0x15c   :  { %v1697_v59 = vmul.f32 %v797_v50, %v233_v53 }
 0x15d   :  { %v2131_v2 = vadd.f32 %v2130_v62, %v1681_v57  ;;  %v234_v57 = vld [vmem:[#allocation3 + $0x5c8] sm:$0xff]  ;;  %v800_v62 = vperm.slane %v522_v45, 3 }
 0x15e   :  { %v1698_v63 = vmul.f32 %v798_v54, %v234_v57 }
 0x15f   :  { %v2132_v6 = vadd.f32 %v2131_v2, %v1682_v61  ;;  %v235_v61 = vld [vmem:[#allocation3 + $0x5d0] sm:$0xff]  ;;  %v801_v2 = vperm.slane %v522_v45, 4 }
 0x160   :  { %v1699_v3 = vmul.f32 %v799_v58, %v235_v61 }
 0x161   :  { %v2133_v10 = vadd.f32 %v2132_v6, %v1683_v1  ;;  %v236_v1 = vld [vmem:[#allocation3 + $0x5d8] sm:$0xff]  ;;  %v802_v6 = vperm.slane %v522_v45, 5 }
 0x162   :  { %v1700_v7 = vmul.f32 %v800_v62, %v236_v1 }
 0x163   :  { %v2134_v15 = vadd.f32 %v2133_v10, %v1684_v5  ;;  %v237_v5 = vld [vmem:[#allocation3 + $0x5e0] sm:$0xff]  ;;  %v803_v10 = vperm.slane %v522_v45, 6 }
 0x164   :  { %v1701_v11 = vmul.f32 %v801_v2, %v237_v5 }
 0x165   :  { %v2135_v19 = vadd.f32 %v2134_v15, %v1685_v9  ;;  %v238_v9 = vld [vmem:[#allocation3 + $0x5e8] sm:$0xff]  ;;  %v804_v15 = vperm.slane %v522_v45, 7  ;;  %v1703_v20 = vmul.f32 %v803_v10, %v239_v13 }
 0x166   :  { %v1702_v16 = vmul.f32 %v802_v6, %v238_v9 }
 0x167   :  { %v2136_v23 = vadd.f32 %v2135_v19, %v1686_v14  ;;  %v523_v14 = vld [vmem:[#allocation5 + $0xc0] sm:$0xff] }
 0x168   :  { %v805_v19 = vperm.slane %v523_v14, 0 }
 0x169   :  { %v2137_v27 = vadd.f32 %v2136_v23, %v1687_v18  ;;  %v240_v18 = vld [vmem:[#allocation3 + $0x5f8] sm:$0xff]  ;;  %v806_v23 = vperm.slane %v523_v14, 1 }
 0x16a   :  { %v1704_v24 = vmul.f32 %v804_v15, %v240_v18  ;;  %v255_v15 = vld [vmem:[#allocation3 + $0x670] sm:$0xff] }
 0x16b   :  { %v2138_v31 = vadd.f32 %v2137_v27, %v1688_v22  ;;  %v241_v22 = vld [vmem:[#allocation3 + $0x600] sm:$0xff]  ;;  %v807_v27 = vperm.slane %v523_v14, 2 }
 0x16c   :  { %v1705_v28 = vmul.f32 %v805_v19, %v241_v22 }
 0x16d   :  { %v2139_v35 = vadd.f32 %v2138_v31, %v1689_v26  ;;  %v242_v26 = vld [vmem:[#allocation3 + $0x608] sm:$0xff]  ;;  %v808_v31 = vperm.slane %v523_v14, 3 }
 0x16e   :  { %v1706_v32 = vmul.f32 %v806_v23, %v242_v26 }
 0x16f   :  { %v2140_v39 = vadd.f32 %v2139_v35, %v1690_v30  ;;  %v243_v30 = vld [vmem:[#allocation3 + $0x610] sm:$0xff]  ;;  %v809_v35 = vperm.slane %v523_v14, 4 }
 0x170   :  { %v1707_v36 = vmul.f32 %v807_v27, %v243_v30 }
 0x171   :  { %v2141_v43 = vadd.f32 %v2140_v39, %v1691_v34  ;;  %v244_v34 = vld [vmem:[#allocation3 + $0x618] sm:$0xff]  ;;  %v810_v39 = vperm.slane %v523_v14, 5 }
 0x172   :  { %v1708_v40 = vmul.f32 %v808_v31, %v244_v34 }
 0x173   :  { %v2142_v48 = vadd.f32 %v2141_v43, %v1692_v38  ;;  %v245_v38 = vld [vmem:[#allocation3 + $0x620] sm:$0xff]  ;;  %v811_v43 = vperm.slane %v523_v14, 6 }
 0x174   :  { %v1709_v44 = vmul.f32 %v809_v35, %v245_v38 }
 0x175   :  { %v2143_v52 = vadd.f32 %v2142_v48, %v1693_v42  ;;  %v246_v42 = vld [vmem:[#allocation3 + $0x628] sm:$0xff]  ;;  %v812_v48 = vperm.slane %v523_v14, 7  ;;  %v1711_v53 = vmul.f32 %v811_v43, %v247_v46 }
 0x176   :  { %v1710_v49 = vmul.f32 %v810_v39, %v246_v42 }
 0x177   :  { %v2144_v56 = vadd.f32 %v2143_v52, %v1694_v47  ;;  %v524_v47 = vld [vmem:[#allocation5 + $0xc8] sm:$0xff] }
 0x178   :  { %v813_v52 = vperm.slane %v524_v47, 0 }
 0x179   :  { %v2145_v60 = vadd.f32 %v2144_v56, %v1695_v51  ;;  %v248_v51 = vld [vmem:[#allocation3 + $0x638] sm:$0xff]  ;;  %v814_v56 = vperm.slane %v524_v47, 1 }
 0x17a   :  { %v1712_v57 = vmul.f32 %v812_v48, %v248_v51  ;;  %v263_v48 = vld [vmem:[#allocation3 + $0x6b0] sm:$0xff] }
 0x17b   :  { %v2146_v0 = vadd.f32 %v2145_v60, %v1696_v55  ;;  %v249_v55 = vld [vmem:[#allocation3 + $0x640] sm:$0xff]  ;;  %v815_v60 = vperm.slane %v524_v47, 2 }
 0x17c   :  { %v1713_v61 = vmul.f32 %v813_v52, %v249_v55 }
 0x17d   :  { %v2147_v4 = vadd.f32 %v2146_v0, %v1697_v59  ;;  %v250_v59 = vld [vmem:[#allocation3 + $0x648] sm:$0xff]  ;;  %v816_v0 = vperm.slane %v524_v47, 3 }
 0x17e   :  { %v1714_v1 = vmul.f32 %v814_v56, %v250_v59 }
 0x17f   :  { %v2148_v8 = vadd.f32 %v2147_v4, %v1698_v63  ;;  %v251_v63 = vld [vmem:[#allocation3 + $0x650] sm:$0xff]  ;;  %v817_v4 = vperm.slane %v524_v47, 4 }
 0x180   :  { %v1715_v5 = vmul.f32 %v815_v60, %v251_v63 }
 0x181   :  { %v2149_v12 = vadd.f32 %v2148_v8, %v1699_v3  ;;  %v252_v3 = vld [vmem:[#allocation3 + $0x658] sm:$0xff]  ;;  %v818_v8 = vperm.slane %v524_v47, 5 }
 0x182   :  { %v1716_v9 = vmul.f32 %v816_v0, %v252_v3 }
 0x183   :  { %v2150_v17 = vadd.f32 %v2149_v12, %v1700_v7  ;;  %v253_v7 = vld [vmem:[#allocation3 + $0x660] sm:$0xff]  ;;  %v819_v12 = vperm.slane %v524_v47, 6 }
 0x184   :  { %v1717_v13 = vmul.f32 %v817_v4, %v253_v7 }
 0x185   :  { %v2151_v21 = vadd.f32 %v2150_v17, %v1701_v11  ;;  %v254_v11 = vld [vmem:[#allocation3 + $0x668] sm:$0xff]  ;;  %v820_v17 = vperm.slane %v524_v47, 7  ;;  %v1719_v22 = vmul.f32 %v819_v12, %v255_v15 }
 0x186   :  { %v1718_v18 = vmul.f32 %v818_v8, %v254_v11 }
 0x187   :  { %v2152_v25 = vadd.f32 %v2151_v21, %v1702_v16  ;;  %v525_v16 = vld [vmem:[#allocation5 + $0xd0] sm:$0xff] }
 0x188   :  { %v821_v21 = vperm.slane %v525_v16, 0 }
 0x189   :  { %v2153_v29 = vadd.f32 %v2152_v25, %v1703_v20  ;;  %v256_v20 = vld [vmem:[#allocation3 + $0x678] sm:$0xff]  ;;  %v822_v25 = vperm.slane %v525_v16, 1 }
 0x18a   :  { %v1720_v26 = vmul.f32 %v820_v17, %v256_v20  ;;  %v271_v17 = vld [vmem:[#allocation3 + $0x6f0] sm:$0xff] }
 0x18b   :  { %v2154_v33 = vadd.f32 %v2153_v29, %v1704_v24  ;;  %v257_v24 = vld [vmem:[#allocation3 + $0x680] sm:$0xff]  ;;  %v823_v29 = vperm.slane %v525_v16, 2 }
 0x18c   :  { %v1721_v30 = vmul.f32 %v821_v21, %v257_v24 }
 0x18d   :  { %v2155_v37 = vadd.f32 %v2154_v33, %v1705_v28  ;;  %v258_v28 = vld [vmem:[#allocation3 + $0x688] sm:$0xff]  ;;  %v824_v33 = vperm.slane %v525_v16, 3 }
 0x18e   :  { %v1722_v34 = vmul.f32 %v822_v25, %v258_v28 }
 0x18f   :  { %v2156_v41 = vadd.f32 %v2155_v37, %v1706_v32  ;;  %v259_v32 = vld [vmem:[#allocation3 + $0x690] sm:$0xff]  ;;  %v825_v37 = vperm.slane %v525_v16, 4 }
 0x190   :  { %v1723_v38 = vmul.f32 %v823_v29, %v259_v32 }
 0x191   :  { %v2157_v45 = vadd.f32 %v2156_v41, %v1707_v36  ;;  %v260_v36 = vld [vmem:[#allocation3 + $0x698] sm:$0xff]  ;;  %v826_v41 = vperm.slane %v525_v16, 5 }
 0x192   :  { %v1724_v42 = vmul.f32 %v824_v33, %v260_v36 }
 0x193   :  { %v2158_v50 = vadd.f32 %v2157_v45, %v1708_v40  ;;  %v261_v40 = vld [vmem:[#allocation3 + $0x6a0] sm:$0xff]  ;;  %v827_v45 = vperm.slane %v525_v16, 6 }
 0x194   :  { %v1725_v46 = vmul.f32 %v825_v37, %v261_v40 }
 0x195   :  { %v2159_v54 = vadd.f32 %v2158_v50, %v1709_v44  ;;  %v262_v44 = vld [vmem:[#allocation3 + $0x6a8] sm:$0xff]  ;;  %v828_v50 = vperm.slane %v525_v16, 7  ;;  %v1727_v55 = vmul.f32 %v827_v45, %v263_v48 }
 0x196   :  { %v1726_v51 = vmul.f32 %v826_v41, %v262_v44 }
 0x197   :  { %v2160_v58 = vadd.f32 %v2159_v54, %v1710_v49  ;;  %v526_v49 = vld [vmem:[#allocation5 + $0xd8] sm:$0xff] }
 0x198   :  { %v829_v54 = vperm.slane %v526_v49, 0 }
 0x199   :  { %v2161_v62 = vadd.f32 %v2160_v58, %v1711_v53  ;;  %v264_v53 = vld [vmem:[#allocation3 + $0x6b8] sm:$0xff]  ;;  %v830_v58 = vperm.slane %v526_v49, 1 }
 0x19a   :  { %v1728_v59 = vmul.f32 %v828_v50, %v264_v53  ;;  %v279_v50 = vld [vmem:[#allocation3 + $0x730] sm:$0xff] }
 0x19b   :  { %v2162_v2 = vadd.f32 %v2161_v62, %v1712_v57  ;;  %v265_v57 = vld [vmem:[#allocation3 + $0x6c0] sm:$0xff]  ;;  %v831_v62 = vperm.slane %v526_v49, 2 }
 0x19c   :  { %v1729_v63 = vmul.f32 %v829_v54, %v265_v57 }
 0x19d   :  { %v2163_v6 = vadd.f32 %v2162_v2, %v1713_v61  ;;  %v266_v61 = vld [vmem:[#allocation3 + $0x6c8] sm:$0xff]  ;;  %v832_v2 = vperm.slane %v526_v49, 3 }
 0x19e   :  { %v1730_v3 = vmul.f32 %v830_v58, %v266_v61 }
 0x19f   :  { %v2164_v10 = vadd.f32 %v2163_v6, %v1714_v1  ;;  %v267_v1 = vld [vmem:[#allocation3 + $0x6d0] sm:$0xff]  ;;  %v833_v6 = vperm.slane %v526_v49, 4 }
 0x1a0   :  { %v1731_v7 = vmul.f32 %v831_v62, %v267_v1 }
 0x1a1   :  { %v2165_v14 = vadd.f32 %v2164_v10, %v1715_v5  ;;  %v268_v5 = vld [vmem:[#allocation3 + $0x6d8] sm:$0xff]  ;;  %v834_v10 = vperm.slane %v526_v49, 5 }
 0x1a2   :  { %v1732_v11 = vmul.f32 %v832_v2, %v268_v5 }
 0x1a3   :  { %v2166_v19 = vadd.f32 %v2165_v14, %v1716_v9  ;;  %v269_v9 = vld [vmem:[#allocation3 + $0x6e0] sm:$0xff]  ;;  %v835_v14 = vperm.slane %v526_v49, 6 }
 0x1a4   :  { %v1733_v15 = vmul.f32 %v833_v6, %v269_v9 }
 0x1a5   :  { %v2167_v23 = vadd.f32 %v2166_v19, %v1717_v13  ;;  %v270_v13 = vld [vmem:[#allocation3 + $0x6e8] sm:$0xff]  ;;  %v836_v19 = vperm.slane %v526_v49, 7  ;;  %v1735_v24 = vmul.f32 %v835_v14, %v271_v17 }
 0x1a6   :  { %v1734_v20 = vmul.f32 %v834_v10, %v270_v13 }
 0x1a7   :  { %v2168_v27 = vadd.f32 %v2167_v23, %v1718_v18  ;;  %v527_v18 = vld [vmem:[#allocation5 + $0xe0] sm:$0xff] }
 0x1a8   :  { %v837_v23 = vperm.slane %v527_v18, 0 }
 0x1a9   :  { %v2169_v31 = vadd.f32 %v2168_v27, %v1719_v22  ;;  %v272_v22 = vld [vmem:[#allocation3 + $0x6f8] sm:$0xff]  ;;  %v838_v27 = vperm.slane %v527_v18, 1 }
 0x1aa   :  { %v1736_v28 = vmul.f32 %v836_v19, %v272_v22  ;;  %v287_v19 = vld [vmem:[#allocation3 + $0x770] sm:$0xff] }
 0x1ab   :  { %v2170_v35 = vadd.f32 %v2169_v31, %v1720_v26  ;;  %v273_v26 = vld [vmem:[#allocation3 + $0x700] sm:$0xff]  ;;  %v839_v31 = vperm.slane %v527_v18, 2 }
 0x1ac   :  { %v1737_v32 = vmul.f32 %v837_v23, %v273_v26 }
 0x1ad   :  { %v2171_v39 = vadd.f32 %v2170_v35, %v1721_v30  ;;  %v274_v30 = vld [vmem:[#allocation3 + $0x708] sm:$0xff]  ;;  %v840_v35 = vperm.slane %v527_v18, 3 }
 0x1ae   :  { %v1738_v36 = vmul.f32 %v838_v27, %v274_v30 }
 0x1af   :  { %v2172_v43 = vadd.f32 %v2171_v39, %v1722_v34  ;;  %v275_v34 = vld [vmem:[#allocation3 + $0x710] sm:$0xff]  ;;  %v841_v39 = vperm.slane %v527_v18, 4 }
 0x1b0   :  { %v1739_v40 = vmul.f32 %v839_v31, %v275_v34 }
 0x1b1   :  { %v2173_v47 = vadd.f32 %v2172_v43, %v1723_v38  ;;  %v276_v38 = vld [vmem:[#allocation3 + $0x718] sm:$0xff]  ;;  %v842_v43 = vperm.slane %v527_v18, 5 }
 0x1b2   :  { %v1740_v44 = vmul.f32 %v840_v35, %v276_v38 }
 0x1b3   :  { %v2174_v52 = vadd.f32 %v2173_v47, %v1724_v42  ;;  %v277_v42 = vld [vmem:[#allocation3 + $0x720] sm:$0xff]  ;;  %v843_v47 = vperm.slane %v527_v18, 6 }
 0x1b4   :  { %v1741_v48 = vmul.f32 %v841_v39, %v277_v42 }
 0x1b5   :  { %v2175_v56 = vadd.f32 %v2174_v52, %v1725_v46  ;;  %v278_v46 = vld [vmem:[#allocation3 + $0x728] sm:$0xff]  ;;  %v844_v52 = vperm.slane %v527_v18, 7  ;;  %v1743_v57 = vmul.f32 %v843_v47, %v279_v50 }
 0x1b6   :  { %v1742_v53 = vmul.f32 %v842_v43, %v278_v46 }
 0x1b7   :  { %v2176_v60 = vadd.f32 %v2175_v56, %v1726_v51  ;;  %v528_v51 = vld [vmem:[#allocation5 + $0xe8] sm:$0xff] }
 0x1b8   :  { %v845_v56 = vperm.slane %v528_v51, 0 }
 0x1b9   :  { %v2177_v0 = vadd.f32 %v2176_v60, %v1727_v55  ;;  %v280_v55 = vld [vmem:[#allocation3 + $0x738] sm:$0xff]  ;;  %v846_v60 = vperm.slane %v528_v51, 1 }
 0x1ba   :  { %v1744_v61 = vmul.f32 %v844_v52, %v280_v55  ;;  %v295_v52 = vld [vmem:[#allocation3 + $0x7b0] sm:$0xff] }
 0x1bb   :  { %v2178_v4 = vadd.f32 %v2177_v0, %v1728_v59  ;;  %v281_v59 = vld [vmem:[#allocation3 + $0x740] sm:$0xff]  ;;  %v847_v0 = vperm.slane %v528_v51, 2 }
 0x1bc   :  { %v1745_v1 = vmul.f32 %v845_v56, %v281_v59 }
 0x1bd   :  { %v2179_v8 = vadd.f32 %v2178_v4, %v1729_v63  ;;  %v282_v63 = vld [vmem:[#allocation3 + $0x748] sm:$0xff]  ;;  %v848_v4 = vperm.slane %v528_v51, 3 }
 0x1be   :  { %v1746_v5 = vmul.f32 %v846_v60, %v282_v63 }
 0x1bf   :  { %v2180_v12 = vadd.f32 %v2179_v8, %v1730_v3  ;;  %v283_v3 = vld [vmem:[#allocation3 + $0x750] sm:$0xff]  ;;  %v849_v8 = vperm.slane %v528_v51, 4 }
 0x1c0   :  { %v1747_v9 = vmul.f32 %v847_v0, %v283_v3 }
 0x1c1   :  { %v2181_v16 = vadd.f32 %v2180_v12, %v1731_v7  ;;  %v284_v7 = vld [vmem:[#allocation3 + $0x758] sm:$0xff]  ;;  %v850_v12 = vperm.slane %v528_v51, 5 }
 0x1c2   :  { %v1748_v13 = vmul.f32 %v848_v4, %v284_v7 }
 0x1c3   :  { %v2182_v21 = vadd.f32 %v2181_v16, %v1732_v11  ;;  %v285_v11 = vld [vmem:[#allocation3 + $0x760] sm:$0xff]  ;;  %v851_v16 = vperm.slane %v528_v51, 6 }
 0x1c4   :  { %v1749_v17 = vmul.f32 %v849_v8, %v285_v11 }
 0x1c5   :  { %v2183_v25 = vadd.f32 %v2182_v21, %v1733_v15  ;;  %v286_v15 = vld [vmem:[#allocation3 + $0x768] sm:$0xff]  ;;  %v852_v21 = vperm.slane %v528_v51, 7  ;;  %v1751_v26 = vmul.f32 %v851_v16, %v287_v19 }
 0x1c6   :  { %v1750_v22 = vmul.f32 %v850_v12, %v286_v15 }
 0x1c7   :  { %v2184_v29 = vadd.f32 %v2183_v25, %v1734_v20  ;;  %v529_v20 = vld [vmem:[#allocation5 + $0xf0] sm:$0xff] }
 0x1c8   :  { %v853_v25 = vperm.slane %v529_v20, 0 }
 0x1c9   :  { %v2185_v33 = vadd.f32 %v2184_v29, %v1735_v24  ;;  %v288_v24 = vld [vmem:[#allocation3 + $0x778] sm:$0xff]  ;;  %v854_v29 = vperm.slane %v529_v20, 1 }
 0x1ca   :  { %v1752_v30 = vmul.f32 %v852_v21, %v288_v24  ;;  %v303_v21 = vld [vmem:[#allocation3 + $0x7f0] sm:$0xff] }
 0x1cb   :  { %v2186_v37 = vadd.f32 %v2185_v33, %v1736_v28  ;;  %v289_v28 = vld [vmem:[#allocation3 + $0x780] sm:$0xff]  ;;  %v855_v33 = vperm.slane %v529_v20, 2 }
 0x1cc   :  { %v1753_v34 = vmul.f32 %v853_v25, %v289_v28 }
 0x1cd   :  { %v2187_v41 = vadd.f32 %v2186_v37, %v1737_v32  ;;  %v290_v32 = vld [vmem:[#allocation3 + $0x788] sm:$0xff]  ;;  %v856_v37 = vperm.slane %v529_v20, 3 }
 0x1ce   :  { %v1754_v38 = vmul.f32 %v854_v29, %v290_v32 }
 0x1cf   :  { %v2188_v45 = vadd.f32 %v2187_v41, %v1738_v36  ;;  %v291_v36 = vld [vmem:[#allocation3 + $0x790] sm:$0xff]  ;;  %v857_v41 = vperm.slane %v529_v20, 4 }
 0x1d0   :  { %v1755_v42 = vmul.f32 %v855_v33, %v291_v36 }
 0x1d1   :  { %v2189_v49 = vadd.f32 %v2188_v45, %v1739_v40  ;;  %v292_v40 = vld [vmem:[#allocation3 + $0x798] sm:$0xff]  ;;  %v858_v45 = vperm.slane %v529_v20, 5 }
 0x1d2   :  { %v1756_v46 = vmul.f32 %v856_v37, %v292_v40 }
 0x1d3   :  { %v2190_v54 = vadd.f32 %v2189_v49, %v1740_v44  ;;  %v293_v44 = vld [vmem:[#allocation3 + $0x7a0] sm:$0xff]  ;;  %v859_v49 = vperm.slane %v529_v20, 6 }
 0x1d4   :  { %v1757_v50 = vmul.f32 %v857_v41, %v293_v44 }
 0x1d5   :  { %v2191_v58 = vadd.f32 %v2190_v54, %v1741_v48  ;;  %v294_v48 = vld [vmem:[#allocation3 + $0x7a8] sm:$0xff]  ;;  %v860_v54 = vperm.slane %v529_v20, 7  ;;  %v1759_v59 = vmul.f32 %v859_v49, %v295_v52 }
 0x1d6   :  { %v1758_v55 = vmul.f32 %v858_v45, %v294_v48 }
 0x1d7   :  { %v2192_v62 = vadd.f32 %v2191_v58, %v1742_v53  ;;  %v530_v53 = vld [vmem:[#allocation5 + $0xf8] sm:$0xff] }
 0x1d8   :  { %v861_v58 = vperm.slane %v530_v53, 0 }
 0x1d9   :  { %v2193_v2 = vadd.f32 %v2192_v62, %v1743_v57  ;;  %v296_v57 = vld [vmem:[#allocation3 + $0x7b8] sm:$0xff]  ;;  %v862_v62 = vperm.slane %v530_v53, 1 }
 0x1da   :  { %v1760_v63 = vmul.f32 %v860_v54, %v296_v57  ;;  %v311_v54 = vld [vmem:[#allocation3 + $0x830] sm:$0xff] }
 0x1db   :  { %v2194_v6 = vadd.f32 %v2193_v2, %v1744_v61  ;;  %v297_v61 = vld [vmem:[#allocation3 + $0x7c0] sm:$0xff]  ;;  %v863_v2 = vperm.slane %v530_v53, 2 }
 0x1dc   :  { %v1761_v3 = vmul.f32 %v861_v58, %v297_v61 }
 0x1dd   :  { %v2195_v10 = vadd.f32 %v2194_v6, %v1745_v1  ;;  %v298_v1 = vld [vmem:[#allocation3 + $0x7c8] sm:$0xff]  ;;  %v864_v6 = vperm.slane %v530_v53, 3 }
 0x1de   :  { %v1762_v7 = vmul.f32 %v862_v62, %v298_v1 }
 0x1df   :  { %v2196_v14 = vadd.f32 %v2195_v10, %v1746_v5  ;;  %v299_v5 = vld [vmem:[#allocation3 + $0x7d0] sm:$0xff]  ;;  %v865_v10 = vperm.slane %v530_v53, 4 }
 0x1e0   :  { %v1763_v11 = vmul.f32 %v863_v2, %v299_v5 }
 0x1e1   :  { %v2197_v18 = vadd.f32 %v2196_v14, %v1747_v9  ;;  %v300_v9 = vld [vmem:[#allocation3 + $0x7d8] sm:$0xff]  ;;  %v866_v14 = vperm.slane %v530_v53, 5 }
 0x1e2   :  { %v1764_v15 = vmul.f32 %v864_v6, %v300_v9 }
 0x1e3   :  { %v2198_v23 = vadd.f32 %v2197_v18, %v1748_v13  ;;  %v301_v13 = vld [vmem:[#allocation3 + $0x7e0] sm:$0xff]  ;;  %v867_v18 = vperm.slane %v530_v53, 6 }
 0x1e4   :  { %v1765_v19 = vmul.f32 %v865_v10, %v301_v13 }
 0x1e5   :  { %v2199_v27 = vadd.f32 %v2198_v23, %v1749_v17  ;;  %v302_v17 = vld [vmem:[#allocation3 + $0x7e8] sm:$0xff]  ;;  %v868_v23 = vperm.slane %v530_v53, 7  ;;  %v1767_v28 = vmul.f32 %v867_v18, %v303_v21 }
 0x1e6   :  { %v1766_v24 = vmul.f32 %v866_v14, %v302_v17 }
 0x1e7   :  { %v2200_v31 = vadd.f32 %v2199_v27, %v1750_v22  ;;  %v531_v22 = vld [vmem:[#allocation5 + $0x100] sm:$0xff] }
 0x1e8   :  { %v869_v27 = vperm.slane %v531_v22, 0 }
 0x1e9   :  { %v2201_v35 = vadd.f32 %v2200_v31, %v1751_v26  ;;  %v304_v26 = vld [vmem:[#allocation3 + $0x7f8] sm:$0xff]  ;;  %v870_v31 = vperm.slane %v531_v22, 1 }
 0x1ea   :  { %v1768_v32 = vmul.f32 %v868_v23, %v304_v26  ;;  %v319_v23 = vld [vmem:[#allocation3 + $0x870] sm:$0xff] }
 0x1eb   :  { %v2202_v39 = vadd.f32 %v2201_v35, %v1752_v30  ;;  %v305_v30 = vld [vmem:[#allocation3 + $0x800] sm:$0xff]  ;;  %v871_v35 = vperm.slane %v531_v22, 2 }
 0x1ec   :  { %v1769_v36 = vmul.f32 %v869_v27, %v305_v30 }
 0x1ed   :  { %v2203_v43 = vadd.f32 %v2202_v39, %v1753_v34  ;;  %v306_v34 = vld [vmem:[#allocation3 + $0x808] sm:$0xff]  ;;  %v872_v39 = vperm.slane %v531_v22, 3 }
 0x1ee   :  { %v1770_v40 = vmul.f32 %v870_v31, %v306_v34 }
 0x1ef   :  { %v2204_v47 = vadd.f32 %v2203_v43, %v1754_v38  ;;  %v307_v38 = vld [vmem:[#allocation3 + $0x810] sm:$0xff]  ;;  %v873_v43 = vperm.slane %v531_v22, 4 }
 0x1f0   :  { %v1771_v44 = vmul.f32 %v871_v35, %v307_v38 }
 0x1f1   :  { %v2205_v51 = vadd.f32 %v2204_v47, %v1755_v42  ;;  %v308_v42 = vld [vmem:[#allocation3 + $0x818] sm:$0xff]  ;;  %v874_v47 = vperm.slane %v531_v22, 5 }
 0x1f2   :  { %v1772_v48 = vmul.f32 %v872_v39, %v308_v42 }
 0x1f3   :  { %v2206_v56 = vadd.f32 %v2205_v51, %v1756_v46  ;;  %v309_v46 = vld [vmem:[#allocation3 + $0x820] sm:$0xff]  ;;  %v875_v51 = vperm.slane %v531_v22, 6 }
 0x1f4   :  { %v1773_v52 = vmul.f32 %v873_v43, %v309_v46 }
 0x1f5   :  { %v2207_v60 = vadd.f32 %v2206_v56, %v1757_v50  ;;  %v310_v50 = vld [vmem:[#allocation3 + $0x828] sm:$0xff]  ;;  %v876_v56 = vperm.slane %v531_v22, 7  ;;  %v1775_v61 = vmul.f32 %v875_v51, %v311_v54 }
 0x1f6   :  { %v1774_v57 = vmul.f32 %v874_v47, %v310_v50 }
 0x1f7   :  { %v2208_v0 = vadd.f32 %v2207_v60, %v1758_v55  ;;  %v532_v55 = vld [vmem:[#allocation5 + $0x108] sm:$0xff] }
 0x1f8   :  { %v877_v60 = vperm.slane %v532_v55, 0 }
 0x1f9   :  { %v2209_v4 = vadd.f32 %v2208_v0, %v1759_v59  ;;  %v312_v59 = vld [vmem:[#allocation3 + $0x838] sm:$0xff]  ;;  %v878_v0 = vperm.slane %v532_v55, 1 }
 0x1fa   :  { %v1776_v1 = vmul.f32 %v876_v56, %v312_v59  ;;  %v327_v56 = vld [vmem:[#allocation3 + $0x8b0] sm:$0xff] }
 0x1fb   :  { %v2210_v8 = vadd.f32 %v2209_v4, %v1760_v63  ;;  %v313_v63 = vld [vmem:[#allocation3 + $0x840] sm:$0xff]  ;;  %v879_v4 = vperm.slane %v532_v55, 2 }
 0x1fc   :  { %v1777_v5 = vmul.f32 %v877_v60, %v313_v63 }
 0x1fd   :  { %v2211_v12 = vadd.f32 %v2210_v8, %v1761_v3  ;;  %v314_v3 = vld [vmem:[#allocation3 + $0x848] sm:$0xff]  ;;  %v880_v8 = vperm.slane %v532_v55, 3 }
 0x1fe   :  { %v1778_v9 = vmul.f32 %v878_v0, %v314_v3 }
 0x1ff   :  { %v2212_v16 = vadd.f32 %v2211_v12, %v1762_v7  ;;  %v315_v7 = vld [vmem:[#allocation3 + $0x850] sm:$0xff]  ;;  %v881_v12 = vperm.slane %v532_v55, 4 }
 0x200   :  { %v1779_v13 = vmul.f32 %v879_v4, %v315_v7 }
 0x201   :  { %v2213_v20 = vadd.f32 %v2212_v16, %v1763_v11  ;;  %v316_v11 = vld [vmem:[#allocation3 + $0x858] sm:$0xff]  ;;  %v882_v16 = vperm.slane %v532_v55, 5 }
 0x202   :  { %v1780_v17 = vmul.f32 %v880_v8, %v316_v11 }
 0x203   :  { %v2214_v25 = vadd.f32 %v2213_v20, %v1764_v15  ;;  %v317_v15 = vld [vmem:[#allocation3 + $0x860] sm:$0xff]  ;;  %v883_v20 = vperm.slane %v532_v55, 6 }
 0x204   :  { %v1781_v21 = vmul.f32 %v881_v12, %v317_v15 }
 0x205   :  { %v2215_v29 = vadd.f32 %v2214_v25, %v1765_v19  ;;  %v318_v19 = vld [vmem:[#allocation3 + $0x868] sm:$0xff]  ;;  %v884_v25 = vperm.slane %v532_v55, 7  ;;  %v1783_v30 = vmul.f32 %v883_v20, %v319_v23 }
 0x206   :  { %v1782_v26 = vmul.f32 %v882_v16, %v318_v19 }
 0x207   :  { %v2216_v33 = vadd.f32 %v2215_v29, %v1766_v24  ;;  %v533_v24 = vld [vmem:[#allocation5 + $0x110] sm:$0xff] }
 0x208   :  { %v885_v29 = vperm.slane %v533_v24, 0 }
 0x209   :  { %v2217_v37 = vadd.f32 %v2216_v33, %v1767_v28  ;;  %v320_v28 = vld [vmem:[#allocation3 + $0x878] sm:$0xff]  ;;  %v886_v33 = vperm.slane %v533_v24, 1 }
 0x20a   :  { %v1784_v34 = vmul.f32 %v884_v25, %v320_v28  ;;  %v335_v25 = vld [vmem:[#allocation3 + $0x8f0] sm:$0xff] }
 0x20b   :  { %v2218_v41 = vadd.f32 %v2217_v37, %v1768_v32  ;;  %v321_v32 = vld [vmem:[#allocation3 + $0x880] sm:$0xff]  ;;  %v887_v37 = vperm.slane %v533_v24, 2 }
 0x20c   :  { %v1785_v38 = vmul.f32 %v885_v29, %v321_v32 }
 0x20d   :  { %v2219_v45 = vadd.f32 %v2218_v41, %v1769_v36  ;;  %v322_v36 = vld [vmem:[#allocation3 + $0x888] sm:$0xff]  ;;  %v888_v41 = vperm.slane %v533_v24, 3 }
 0x20e   :  { %v1786_v42 = vmul.f32 %v886_v33, %v322_v36 }
 0x20f   :  { %v2220_v49 = vadd.f32 %v2219_v45, %v1770_v40  ;;  %v323_v40 = vld [vmem:[#allocation3 + $0x890] sm:$0xff]  ;;  %v889_v45 = vperm.slane %v533_v24, 4 }
 0x210   :  { %v1787_v46 = vmul.f32 %v887_v37, %v323_v40 }
 0x211   :  { %v2221_v53 = vadd.f32 %v2220_v49, %v1771_v44  ;;  %v324_v44 = vld [vmem:[#allocation3 + $0x898] sm:$0xff]  ;;  %v890_v49 = vperm.slane %v533_v24, 5 }
 0x212   :  { %v1788_v50 = vmul.f32 %v888_v41, %v324_v44 }
 0x213   :  { %v2222_v58 = vadd.f32 %v2221_v53, %v1772_v48  ;;  %v325_v48 = vld [vmem:[#allocation3 + $0x8a0] sm:$0xff]  ;;  %v891_v53 = vperm.slane %v533_v24, 6 }
 0x214   :  { %v1789_v54 = vmul.f32 %v889_v45, %v325_v48 }
 0x215   :  { %v2223_v62 = vadd.f32 %v2222_v58, %v1773_v52  ;;  %v326_v52 = vld [vmem:[#allocation3 + $0x8a8] sm:$0xff]  ;;  %v892_v58 = vperm.slane %v533_v24, 7  ;;  %v1791_v63 = vmul.f32 %v891_v53, %v327_v56 }
 0x216   :  { %v1790_v59 = vmul.f32 %v890_v49, %v326_v52 }
 0x217   :  { %v2224_v2 = vadd.f32 %v2223_v62, %v1774_v57  ;;  %v534_v57 = vld [vmem:[#allocation5 + $0x118] sm:$0xff] }
 0x218   :  { %v893_v62 = vperm.slane %v534_v57, 0 }
 0x219   :  { %v2225_v6 = vadd.f32 %v2224_v2, %v1775_v61  ;;  %v328_v61 = vld [vmem:[#allocation3 + $0x8b8] sm:$0xff]  ;;  %v894_v2 = vperm.slane %v534_v57, 1 }
 0x21a   :  { %v1792_v3 = vmul.f32 %v892_v58, %v328_v61  ;;  %v343_v58 = vld [vmem:[#allocation3 + $0x930] sm:$0xff] }
 0x21b   :  { %v2226_v10 = vadd.f32 %v2225_v6, %v1776_v1  ;;  %v329_v1 = vld [vmem:[#allocation3 + $0x8c0] sm:$0xff]  ;;  %v895_v6 = vperm.slane %v534_v57, 2 }
 0x21c   :  { %v1793_v7 = vmul.f32 %v893_v62, %v329_v1 }
 0x21d   :  { %v2227_v14 = vadd.f32 %v2226_v10, %v1777_v5  ;;  %v330_v5 = vld [vmem:[#allocation3 + $0x8c8] sm:$0xff]  ;;  %v896_v10 = vperm.slane %v534_v57, 3 }
 0x21e   :  { %v1794_v11 = vmul.f32 %v894_v2, %v330_v5 }
 0x21f   :  { %v2228_v18 = vadd.f32 %v2227_v14, %v1778_v9  ;;  %v331_v9 = vld [vmem:[#allocation3 + $0x8d0] sm:$0xff]  ;;  %v897_v14 = vperm.slane %v534_v57, 4 }
 0x220   :  { %v1795_v15 = vmul.f32 %v895_v6, %v331_v9 }
 0x221   :  { %v2229_v22 = vadd.f32 %v2228_v18, %v1779_v13  ;;  %v332_v13 = vld [vmem:[#allocation3 + $0x8d8] sm:$0xff]  ;;  %v898_v18 = vperm.slane %v534_v57, 5 }
 0x222   :  { %v1796_v19 = vmul.f32 %v896_v10, %v332_v13 }
 0x223   :  { %v2230_v27 = vadd.f32 %v2229_v22, %v1780_v17  ;;  %v333_v17 = vld [vmem:[#allocation3 + $0x8e0] sm:$0xff]  ;;  %v899_v22 = vperm.slane %v534_v57, 6 }
 0x224   :  { %v1797_v23 = vmul.f32 %v897_v14, %v333_v17 }
 0x225   :  { %v2231_v31 = vadd.f32 %v2230_v27, %v1781_v21  ;;  %v334_v21 = vld [vmem:[#allocation3 + $0x8e8] sm:$0xff]  ;;  %v900_v27 = vperm.slane %v534_v57, 7  ;;  %v1799_v32 = vmul.f32 %v899_v22, %v335_v25 }
 0x226   :  { %v1798_v28 = vmul.f32 %v898_v18, %v334_v21 }
 0x227   :  { %v2232_v35 = vadd.f32 %v2231_v31, %v1782_v26  ;;  %v535_v26 = vld [vmem:[#allocation5 + $0x120] sm:$0xff] }
 0x228   :  { %v901_v31 = vperm.slane %v535_v26, 0 }
 0x229   :  { %v2233_v39 = vadd.f32 %v2232_v35, %v1783_v30  ;;  %v336_v30 = vld [vmem:[#allocation3 + $0x8f8] sm:$0xff]  ;;  %v902_v35 = vperm.slane %v535_v26, 1 }
 0x22a   :  { %v1800_v36 = vmul.f32 %v900_v27, %v336_v30  ;;  %v351_v27 = vld [vmem:[#allocation3 + $0x970] sm:$0xff] }
 0x22b   :  { %v2234_v43 = vadd.f32 %v2233_v39, %v1784_v34  ;;  %v337_v34 = vld [vmem:[#allocation3 + $0x900] sm:$0xff]  ;;  %v903_v39 = vperm.slane %v535_v26, 2 }
 0x22c   :  { %v1801_v40 = vmul.f32 %v901_v31, %v337_v34 }
 0x22d   :  { %v2235_v47 = vadd.f32 %v2234_v43, %v1785_v38  ;;  %v338_v38 = vld [vmem:[#allocation3 + $0x908] sm:$0xff]  ;;  %v904_v43 = vperm.slane %v535_v26, 3 }
 0x22e   :  { %v1802_v44 = vmul.f32 %v902_v35, %v338_v38 }
 0x22f   :  { %v2236_v51 = vadd.f32 %v2235_v47, %v1786_v42  ;;  %v339_v42 = vld [vmem:[#allocation3 + $0x910] sm:$0xff]  ;;  %v905_v47 = vperm.slane %v535_v26, 4 }
 0x230   :  { %v1803_v48 = vmul.f32 %v903_v39, %v339_v42 }
 0x231   :  { %v2237_v55 = vadd.f32 %v2236_v51, %v1787_v46  ;;  %v340_v46 = vld [vmem:[#allocation3 + $0x918] sm:$0xff]  ;;  %v906_v51 = vperm.slane %v535_v26, 5 }
 0x232   :  { %v1804_v52 = vmul.f32 %v904_v43, %v340_v46 }
 0x233   :  { %v2238_v60 = vadd.f32 %v2237_v55, %v1788_v50  ;;  %v341_v50 = vld [vmem:[#allocation3 + $0x920] sm:$0xff]  ;;  %v907_v55 = vperm.slane %v535_v26, 6 }
 0x234   :  { %v1805_v56 = vmul.f32 %v905_v47, %v341_v50 }
 0x235   :  { %v2239_v0 = vadd.f32 %v2238_v60, %v1789_v54  ;;  %v342_v54 = vld [vmem:[#allocation3 + $0x928] sm:$0xff]  ;;  %v908_v60 = vperm.slane %v535_v26, 7  ;;  %v1807_v1 = vmul.f32 %v907_v55, %v343_v58 }
 0x236   :  { %v1806_v61 = vmul.f32 %v906_v51, %v342_v54 }
 0x237   :  { %v2240_v4 = vadd.f32 %v2239_v0, %v1790_v59  ;;  %v536_v59 = vld [vmem:[#allocation5 + $0x128] sm:$0xff] }
 0x238   :  { %v909_v0 = vperm.slane %v536_v59, 0 }
 0x239   :  { %v2241_v8 = vadd.f32 %v2240_v4, %v1791_v63  ;;  %v344_v63 = vld [vmem:[#allocation3 + $0x938] sm:$0xff]  ;;  %v910_v4 = vperm.slane %v536_v59, 1 }
 0x23a   :  { %v1808_v5 = vmul.f32 %v908_v60, %v344_v63  ;;  %v359_v60 = vld [vmem:[#allocation3 + $0x9b0] sm:$0xff] }
 0x23b   :  { %v2242_v12 = vadd.f32 %v2241_v8, %v1792_v3  ;;  %v345_v3 = vld [vmem:[#allocation3 + $0x940] sm:$0xff]  ;;  %v911_v8 = vperm.slane %v536_v59, 2 }
 0x23c   :  { %v1809_v9 = vmul.f32 %v909_v0, %v345_v3 }
 0x23d   :  { %v2243_v16 = vadd.f32 %v2242_v12, %v1793_v7  ;;  %v346_v7 = vld [vmem:[#allocation3 + $0x948] sm:$0xff]  ;;  %v912_v12 = vperm.slane %v536_v59, 3 }
 0x23e   :  { %v1810_v13 = vmul.f32 %v910_v4, %v346_v7 }
 0x23f   :  { %v2244_v20 = vadd.f32 %v2243_v16, %v1794_v11  ;;  %v347_v11 = vld [vmem:[#allocation3 + $0x950] sm:$0xff]  ;;  %v913_v16 = vperm.slane %v536_v59, 4 }
 0x240   :  { %v1811_v17 = vmul.f32 %v911_v8, %v347_v11 }
 0x241   :  { %v2245_v24 = vadd.f32 %v2244_v20, %v1795_v15  ;;  %v348_v15 = vld [vmem:[#allocation3 + $0x958] sm:$0xff]  ;;  %v914_v20 = vperm.slane %v536_v59, 5 }
 0x242   :  { %v1812_v21 = vmul.f32 %v912_v12, %v348_v15 }
 0x243   :  { %v2246_v29 = vadd.f32 %v2245_v24, %v1796_v19  ;;  %v349_v19 = vld [vmem:[#allocation3 + $0x960] sm:$0xff]  ;;  %v915_v24 = vperm.slane %v536_v59, 6 }
 0x244   :  { %v1813_v25 = vmul.f32 %v913_v16, %v349_v19 }
 0x245   :  { %v2247_v33 = vadd.f32 %v2246_v29, %v1797_v23  ;;  %v350_v23 = vld [vmem:[#allocation3 + $0x968] sm:$0xff]  ;;  %v916_v29 = vperm.slane %v536_v59, 7  ;;  %v1815_v34 = vmul.f32 %v915_v24, %v351_v27 }
 0x246   :  { %v1814_v30 = vmul.f32 %v914_v20, %v350_v23 }
 0x247   :  { %v2248_v37 = vadd.f32 %v2247_v33, %v1798_v28  ;;  %v537_v28 = vld [vmem:[#allocation5 + $0x130] sm:$0xff] }
 0x248   :  { %v917_v33 = vperm.slane %v537_v28, 0 }
 0x249   :  { %v2249_v41 = vadd.f32 %v2248_v37, %v1799_v32  ;;  %v352_v32 = vld [vmem:[#allocation3 + $0x978] sm:$0xff]  ;;  %v918_v37 = vperm.slane %v537_v28, 1 }
 0x24a   :  { %v1816_v38 = vmul.f32 %v916_v29, %v352_v32  ;;  %v367_v29 = vld [vmem:[#allocation3 + $0x9f0] sm:$0xff] }
 0x24b   :  { %v2250_v45 = vadd.f32 %v2249_v41, %v1800_v36  ;;  %v353_v36 = vld [vmem:[#allocation3 + $0x980] sm:$0xff]  ;;  %v919_v41 = vperm.slane %v537_v28, 2 }
 0x24c   :  { %v1817_v42 = vmul.f32 %v917_v33, %v353_v36 }
 0x24d   :  { %v2251_v49 = vadd.f32 %v2250_v45, %v1801_v40  ;;  %v354_v40 = vld [vmem:[#allocation3 + $0x988] sm:$0xff]  ;;  %v920_v45 = vperm.slane %v537_v28, 3 }
 0x24e   :  { %v1818_v46 = vmul.f32 %v918_v37, %v354_v40 }
 0x24f   :  { %v2252_v53 = vadd.f32 %v2251_v49, %v1802_v44  ;;  %v355_v44 = vld [vmem:[#allocation3 + $0x990] sm:$0xff]  ;;  %v921_v49 = vperm.slane %v537_v28, 4 }
 0x250   :  { %v1819_v50 = vmul.f32 %v919_v41, %v355_v44 }
 0x251   :  { %v2253_v57 = vadd.f32 %v2252_v53, %v1803_v48  ;;  %v356_v48 = vld [vmem:[#allocation3 + $0x998] sm:$0xff]  ;;  %v922_v53 = vperm.slane %v537_v28, 5 }
 0x252   :  { %v1820_v54 = vmul.f32 %v920_v45, %v356_v48 }
 0x253   :  { %v2254_v62 = vadd.f32 %v2253_v57, %v1804_v52  ;;  %v357_v52 = vld [vmem:[#allocation3 + $0x9a0] sm:$0xff]  ;;  %v923_v57 = vperm.slane %v537_v28, 6 }
 0x254   :  { %v1821_v58 = vmul.f32 %v921_v49, %v357_v52 }
 0x255   :  { %v2255_v2 = vadd.f32 %v2254_v62, %v1805_v56  ;;  %v358_v56 = vld [vmem:[#allocation3 + $0x9a8] sm:$0xff]  ;;  %v924_v62 = vperm.slane %v537_v28, 7  ;;  %v1823_v3 = vmul.f32 %v923_v57, %v359_v60 }
 0x256   :  { %v1822_v63 = vmul.f32 %v922_v53, %v358_v56 }
 0x257   :  { %v2256_v6 = vadd.f32 %v2255_v2, %v1806_v61  ;;  %v538_v61 = vld [vmem:[#allocation5 + $0x138] sm:$0xff] }
 0x258   :  { %v925_v2 = vperm.slane %v538_v61, 0 }
 0x259   :  { %v2257_v10 = vadd.f32 %v2256_v6, %v1807_v1  ;;  %v360_v1 = vld [vmem:[#allocation3 + $0x9b8] sm:$0xff]  ;;  %v926_v6 = vperm.slane %v538_v61, 1 }
 0x25a   :  { %v1824_v7 = vmul.f32 %v924_v62, %v360_v1  ;;  %v375_v62 = vld [vmem:[#allocation3 + $0xa30] sm:$0xff] }
 0x25b   :  { %v2258_v14 = vadd.f32 %v2257_v10, %v1808_v5  ;;  %v361_v5 = vld [vmem:[#allocation3 + $0x9c0] sm:$0xff]  ;;  %v927_v10 = vperm.slane %v538_v61, 2 }
 0x25c   :  { %v1825_v11 = vmul.f32 %v925_v2, %v361_v5 }
 0x25d   :  { %v2259_v18 = vadd.f32 %v2258_v14, %v1809_v9  ;;  %v362_v9 = vld [vmem:[#allocation3 + $0x9c8] sm:$0xff]  ;;  %v928_v14 = vperm.slane %v538_v61, 3 }
 0x25e   :  { %v1826_v15 = vmul.f32 %v926_v6, %v362_v9 }
 0x25f   :  { %v2260_v22 = vadd.f32 %v2259_v18, %v1810_v13  ;;  %v363_v13 = vld [vmem:[#allocation3 + $0x9d0] sm:$0xff]  ;;  %v929_v18 = vperm.slane %v538_v61, 4 }
 0x260   :  { %v1827_v19 = vmul.f32 %v927_v10, %v363_v13 }
 0x261   :  { %v2261_v26 = vadd.f32 %v2260_v22, %v1811_v17  ;;  %v364_v17 = vld [vmem:[#allocation3 + $0x9d8] sm:$0xff]  ;;  %v930_v22 = vperm.slane %v538_v61, 5 }
 0x262   :  { %v1828_v23 = vmul.f32 %v928_v14, %v364_v17 }
 0x263   :  { %v2262_v31 = vadd.f32 %v2261_v26, %v1812_v21  ;;  %v365_v21 = vld [vmem:[#allocation3 + $0x9e0] sm:$0xff]  ;;  %v931_v26 = vperm.slane %v538_v61, 6 }
 0x264   :  { %v1829_v27 = vmul.f32 %v929_v18, %v365_v21 }
 0x265   :  { %v2263_v35 = vadd.f32 %v2262_v31, %v1813_v25  ;;  %v366_v25 = vld [vmem:[#allocation3 + $0x9e8] sm:$0xff]  ;;  %v932_v31 = vperm.slane %v538_v61, 7  ;;  %v1831_v36 = vmul.f32 %v931_v26, %v367_v29 }
 0x266   :  { %v1830_v32 = vmul.f32 %v930_v22, %v366_v25 }
 0x267   :  { %v2264_v39 = vadd.f32 %v2263_v35, %v1814_v30  ;;  %v539_v30 = vld [vmem:[#allocation5 + $0x140] sm:$0xff] }
 0x268   :  { %v933_v35 = vperm.slane %v539_v30, 0 }
 0x269   :  { %v2265_v43 = vadd.f32 %v2264_v39, %v1815_v34  ;;  %v368_v34 = vld [vmem:[#allocation3 + $0x9f8] sm:$0xff]  ;;  %v934_v39 = vperm.slane %v539_v30, 1 }
 0x26a   :  { %v1832_v40 = vmul.f32 %v932_v31, %v368_v34  ;;  %v383_v31 = vld [vmem:[#allocation3 + $0xa70] sm:$0xff] }
 0x26b   :  { %v2266_v47 = vadd.f32 %v2265_v43, %v1816_v38  ;;  %v369_v38 = vld [vmem:[#allocation3 + $0xa00] sm:$0xff]  ;;  %v935_v43 = vperm.slane %v539_v30, 2 }
 0x26c   :  { %v1833_v44 = vmul.f32 %v933_v35, %v369_v38 }
 0x26d   :  { %v2267_v51 = vadd.f32 %v2266_v47, %v1817_v42  ;;  %v370_v42 = vld [vmem:[#allocation3 + $0xa08] sm:$0xff]  ;;  %v936_v47 = vperm.slane %v539_v30, 3 }
 0x26e   :  { %v1834_v48 = vmul.f32 %v934_v39, %v370_v42 }
 0x26f   :  { %v2268_v55 = vadd.f32 %v2267_v51, %v1818_v46  ;;  %v371_v46 = vld [vmem:[#allocation3 + $0xa10] sm:$0xff]  ;;  %v937_v51 = vperm.slane %v539_v30, 4 }
 0x270   :  { %v1835_v52 = vmul.f32 %v935_v43, %v371_v46 }
 0x271   :  { %v2269_v59 = vadd.f32 %v2268_v55, %v1819_v50  ;;  %v372_v50 = vld [vmem:[#allocation3 + $0xa18] sm:$0xff]  ;;  %v938_v55 = vperm.slane %v539_v30, 5 }
 0x272   :  { %v1836_v56 = vmul.f32 %v936_v47, %v372_v50 }
 0x273   :  { %v2270_v0 = vadd.f32 %v2269_v59, %v1820_v54  ;;  %v373_v54 = vld [vmem:[#allocation3 + $0xa20] sm:$0xff]  ;;  %v939_v59 = vperm.slane %v539_v30, 6 }
 0x274   :  { %v1837_v60 = vmul.f32 %v937_v51, %v373_v54 }
 0x275   :  { %v2271_v4 = vadd.f32 %v2270_v0, %v1821_v58  ;;  %v374_v58 = vld [vmem:[#allocation3 + $0xa28] sm:$0xff]  ;;  %v940_v0 = vperm.slane %v539_v30, 7  ;;  %v1839_v5 = vmul.f32 %v939_v59, %v375_v62 }
 0x276   :  { %v1838_v1 = vmul.f32 %v938_v55, %v374_v58 }
 0x277   :  { %v2272_v8 = vadd.f32 %v2271_v4, %v1822_v63  ;;  %v540_v63 = vld [vmem:[#allocation5 + $0x148] sm:$0xff] }
 0x278   :  { %v941_v4 = vperm.slane %v540_v63, 0 }
 0x279   :  { %v2273_v12 = vadd.f32 %v2272_v8, %v1823_v3  ;;  %v376_v3 = vld [vmem:[#allocation3 + $0xa38] sm:$0xff]  ;;  %v942_v8 = vperm.slane %v540_v63, 1 }
 0x27a   :  { %v1840_v9 = vmul.f32 %v940_v0, %v376_v3  ;;  %v391_v0 = vld [vmem:[#allocation3 + $0xab0] sm:$0xff] }
 0x27b   :  { %v2274_v16 = vadd.f32 %v2273_v12, %v1824_v7  ;;  %v377_v7 = vld [vmem:[#allocation3 + $0xa40] sm:$0xff]  ;;  %v943_v12 = vperm.slane %v540_v63, 2 }
 0x27c   :  { %v1841_v13 = vmul.f32 %v941_v4, %v377_v7 }
 0x27d   :  { %v2275_v20 = vadd.f32 %v2274_v16, %v1825_v11  ;;  %v378_v11 = vld [vmem:[#allocation3 + $0xa48] sm:$0xff]  ;;  %v944_v16 = vperm.slane %v540_v63, 3 }
 0x27e   :  { %v1842_v17 = vmul.f32 %v942_v8, %v378_v11 }
 0x27f   :  { %v2276_v24 = vadd.f32 %v2275_v20, %v1826_v15  ;;  %v379_v15 = vld [vmem:[#allocation3 + $0xa50] sm:$0xff]  ;;  %v945_v20 = vperm.slane %v540_v63, 4 }
 0x280   :  { %v1843_v21 = vmul.f32 %v943_v12, %v379_v15 }
 0x281   :  { %v2277_v28 = vadd.f32 %v2276_v24, %v1827_v19  ;;  %v380_v19 = vld [vmem:[#allocation3 + $0xa58] sm:$0xff]  ;;  %v946_v24 = vperm.slane %v540_v63, 5 }
 0x282   :  { %v1844_v25 = vmul.f32 %v944_v16, %v380_v19 }
 0x283   :  { %v2278_v33 = vadd.f32 %v2277_v28, %v1828_v23  ;;  %v381_v23 = vld [vmem:[#allocation3 + $0xa60] sm:$0xff]  ;;  %v947_v28 = vperm.slane %v540_v63, 6 }
 0x284   :  { %v1845_v29 = vmul.f32 %v945_v20, %v381_v23 }
 0x285   :  { %v2279_v37 = vadd.f32 %v2278_v33, %v1829_v27  ;;  %v382_v27 = vld [vmem:[#allocation3 + $0xa68] sm:$0xff]  ;;  %v948_v33 = vperm.slane %v540_v63, 7  ;;  %v1847_v38 = vmul.f32 %v947_v28, %v383_v31 }
 0x286   :  { %v1846_v34 = vmul.f32 %v946_v24, %v382_v27 }
 0x287   :  { %v2280_v41 = vadd.f32 %v2279_v37, %v1830_v32  ;;  %v541_v32 = vld [vmem:[#allocation5 + $0x150] sm:$0xff] }
 0x288   :  { %v949_v37 = vperm.slane %v541_v32, 0 }
 0x289   :  { %v2281_v45 = vadd.f32 %v2280_v41, %v1831_v36  ;;  %v384_v36 = vld [vmem:[#allocation3 + $0xa78] sm:$0xff]  ;;  %v950_v41 = vperm.slane %v541_v32, 1 }
 0x28a   :  { %v1848_v42 = vmul.f32 %v948_v33, %v384_v36  ;;  %v399_v33 = vld [vmem:[#allocation3 + $0xaf0] sm:$0xff] }
 0x28b   :  { %v2282_v49 = vadd.f32 %v2281_v45, %v1832_v40  ;;  %v385_v40 = vld [vmem:[#allocation3 + $0xa80] sm:$0xff]  ;;  %v951_v45 = vperm.slane %v541_v32, 2 }
 0x28c   :  { %v1849_v46 = vmul.f32 %v949_v37, %v385_v40 }
 0x28d   :  { %v2283_v53 = vadd.f32 %v2282_v49, %v1833_v44  ;;  %v386_v44 = vld [vmem:[#allocation3 + $0xa88] sm:$0xff]  ;;  %v952_v49 = vperm.slane %v541_v32, 3 }
 0x28e   :  { %v1850_v50 = vmul.f32 %v950_v41, %v386_v44 }
 0x28f   :  { %v2284_v57 = vadd.f32 %v2283_v53, %v1834_v48  ;;  %v387_v48 = vld [vmem:[#allocation3 + $0xa90] sm:$0xff]  ;;  %v953_v53 = vperm.slane %v541_v32, 4 }
 0x290   :  { %v1851_v54 = vmul.f32 %v951_v45, %v387_v48 }
 0x291   :  { %v2285_v61 = vadd.f32 %v2284_v57, %v1835_v52  ;;  %v388_v52 = vld [vmem:[#allocation3 + $0xa98] sm:$0xff]  ;;  %v954_v57 = vperm.slane %v541_v32, 5 }
 0x292   :  { %v1852_v58 = vmul.f32 %v952_v49, %v388_v52 }
 0x293   :  { %v2286_v2 = vadd.f32 %v2285_v61, %v1836_v56  ;;  %v389_v56 = vld [vmem:[#allocation3 + $0xaa0] sm:$0xff]  ;;  %v955_v61 = vperm.slane %v541_v32, 6 }
 0x294   :  { %v1853_v62 = vmul.f32 %v953_v53, %v389_v56 }
 0x295   :  { %v2287_v6 = vadd.f32 %v2286_v2, %v1837_v60  ;;  %v390_v60 = vld [vmem:[#allocation3 + $0xaa8] sm:$0xff]  ;;  %v956_v2 = vperm.slane %v541_v32, 7  ;;  %v1855_v7 = vmul.f32 %v955_v61, %v391_v0 }
 0x296   :  { %v1854_v3 = vmul.f32 %v954_v57, %v390_v60 }
 0x297   :  { %v2288_v10 = vadd.f32 %v2287_v6, %v1838_v1  ;;  %v542_v1 = vld [vmem:[#allocation5 + $0x158] sm:$0xff] }
 0x298   :  { %v957_v6 = vperm.slane %v542_v1, 0 }
 0x299   :  { %v2289_v14 = vadd.f32 %v2288_v10, %v1839_v5  ;;  %v392_v5 = vld [vmem:[#allocation3 + $0xab8] sm:$0xff]  ;;  %v958_v10 = vperm.slane %v542_v1, 1 }
 0x29a   :  { %v1856_v11 = vmul.f32 %v956_v2, %v392_v5  ;;  %v407_v2 = vld [vmem:[#allocation3 + $0xb30] sm:$0xff] }
 0x29b   :  { %v2290_v18 = vadd.f32 %v2289_v14, %v1840_v9  ;;  %v393_v9 = vld [vmem:[#allocation3 + $0xac0] sm:$0xff]  ;;  %v959_v14 = vperm.slane %v542_v1, 2 }
 0x29c   :  { %v1857_v15 = vmul.f32 %v957_v6, %v393_v9 }
 0x29d   :  { %v2291_v22 = vadd.f32 %v2290_v18, %v1841_v13  ;;  %v394_v13 = vld [vmem:[#allocation3 + $0xac8] sm:$0xff]  ;;  %v960_v18 = vperm.slane %v542_v1, 3 }
 0x29e   :  { %v1858_v19 = vmul.f32 %v958_v10, %v394_v13 }
 0x29f   :  { %v2292_v26 = vadd.f32 %v2291_v22, %v1842_v17  ;;  %v395_v17 = vld [vmem:[#allocation3 + $0xad0] sm:$0xff]  ;;  %v961_v22 = vperm.slane %v542_v1, 4 }
 0x2a0   :  { %v1859_v23 = vmul.f32 %v959_v14, %v395_v17 }
 0x2a1   :  { %v2293_v30 = vadd.f32 %v2292_v26, %v1843_v21  ;;  %v396_v21 = vld [vmem:[#allocation3 + $0xad8] sm:$0xff]  ;;  %v962_v26 = vperm.slane %v542_v1, 5 }
 0x2a2   :  { %v1860_v27 = vmul.f32 %v960_v18, %v396_v21 }
 0x2a3   :  { %v2294_v35 = vadd.f32 %v2293_v30, %v1844_v25  ;;  %v397_v25 = vld [vmem:[#allocation3 + $0xae0] sm:$0xff]  ;;  %v963_v30 = vperm.slane %v542_v1, 6 }
 0x2a4   :  { %v1861_v31 = vmul.f32 %v961_v22, %v397_v25 }
 0x2a5   :  { %v2295_v39 = vadd.f32 %v2294_v35, %v1845_v29  ;;  %v398_v29 = vld [vmem:[#allocation3 + $0xae8] sm:$0xff]  ;;  %v964_v35 = vperm.slane %v542_v1, 7  ;;  %v1863_v40 = vmul.f32 %v963_v30, %v399_v33 }
 0x2a6   :  { %v1862_v36 = vmul.f32 %v962_v26, %v398_v29 }
 0x2a7   :  { %v2296_v43 = vadd.f32 %v2295_v39, %v1846_v34  ;;  %v543_v34 = vld [vmem:[#allocation5 + $0x160] sm:$0xff] }
 0x2a8   :  { %v965_v39 = vperm.slane %v543_v34, 0 }
 0x2a9   :  { %v2297_v47 = vadd.f32 %v2296_v43, %v1847_v38  ;;  %v400_v38 = vld [vmem:[#allocation3 + $0xaf8] sm:$0xff]  ;;  %v966_v43 = vperm.slane %v543_v34, 1 }
 0x2aa   :  { %v1864_v44 = vmul.f32 %v964_v35, %v400_v38  ;;  %v415_v35 = vld [vmem:[#allocation3 + $0xb70] sm:$0xff] }
 0x2ab   :  { %v2298_v51 = vadd.f32 %v2297_v47, %v1848_v42  ;;  %v401_v42 = vld [vmem:[#allocation3 + $0xb00] sm:$0xff]  ;;  %v967_v47 = vperm.slane %v543_v34, 2 }
 0x2ac   :  { %v1865_v48 = vmul.f32 %v965_v39, %v401_v42 }
 0x2ad   :  { %v2299_v55 = vadd.f32 %v2298_v51, %v1849_v46  ;;  %v402_v46 = vld [vmem:[#allocation3 + $0xb08] sm:$0xff]  ;;  %v968_v51 = vperm.slane %v543_v34, 3 }
 0x2ae   :  { %v1866_v52 = vmul.f32 %v966_v43, %v402_v46 }
 0x2af   :  { %v2300_v59 = vadd.f32 %v2299_v55, %v1850_v50  ;;  %v403_v50 = vld [vmem:[#allocation3 + $0xb10] sm:$0xff]  ;;  %v969_v55 = vperm.slane %v543_v34, 4 }
 0x2b0   :  { %v1867_v56 = vmul.f32 %v967_v47, %v403_v50 }
 0x2b1   :  { %v2301_v63 = vadd.f32 %v2300_v59, %v1851_v54  ;;  %v404_v54 = vld [vmem:[#allocation3 + $0xb18] sm:$0xff]  ;;  %v970_v59 = vperm.slane %v543_v34, 5 }
 0x2b2   :  { %v1868_v60 = vmul.f32 %v968_v51, %v404_v54 }
 0x2b3   :  { %v2302_v4 = vadd.f32 %v2301_v63, %v1852_v58  ;;  %v405_v58 = vld [vmem:[#allocation3 + $0xb20] sm:$0xff]  ;;  %v971_v63 = vperm.slane %v543_v34, 6 }
 0x2b4   :  { %v1869_v0 = vmul.f32 %v969_v55, %v405_v58 }
 0x2b5   :  { %v2303_v8 = vadd.f32 %v2302_v4, %v1853_v62  ;;  %v406_v62 = vld [vmem:[#allocation3 + $0xb28] sm:$0xff]  ;;  %v972_v4 = vperm.slane %v543_v34, 7  ;;  %v1871_v9 = vmul.f32 %v971_v63, %v407_v2 }
 0x2b6   :  { %v1870_v5 = vmul.f32 %v970_v59, %v406_v62 }
 0x2b7   :  { %v2304_v12 = vadd.f32 %v2303_v8, %v1854_v3  ;;  %v544_v3 = vld [vmem:[#allocation5 + $0x168] sm:$0xff] }
 0x2b8   :  { %v973_v8 = vperm.slane %v544_v3, 0 }
 0x2b9   :  { %v2305_v16 = vadd.f32 %v2304_v12, %v1855_v7  ;;  %v408_v7 = vld [vmem:[#allocation3 + $0xb38] sm:$0xff]  ;;  %v974_v12 = vperm.slane %v544_v3, 1 }
 0x2ba   :  { %v1872_v13 = vmul.f32 %v972_v4, %v408_v7  ;;  %v423_v4 = vld [vmem:[#allocation3 + $0xbb0] sm:$0xff] }
 0x2bb   :  { %v2306_v20 = vadd.f32 %v2305_v16, %v1856_v11  ;;  %v409_v11 = vld [vmem:[#allocation3 + $0xb40] sm:$0xff]  ;;  %v975_v16 = vperm.slane %v544_v3, 2 }
 0x2bc   :  { %v1873_v17 = vmul.f32 %v973_v8, %v409_v11 }
 0x2bd   :  { %v2307_v24 = vadd.f32 %v2306_v20, %v1857_v15  ;;  %v410_v15 = vld [vmem:[#allocation3 + $0xb48] sm:$0xff]  ;;  %v976_v20 = vperm.slane %v544_v3, 3 }
 0x2be   :  { %v1874_v21 = vmul.f32 %v974_v12, %v410_v15 }
 0x2bf   :  { %v2308_v28 = vadd.f32 %v2307_v24, %v1858_v19  ;;  %v411_v19 = vld [vmem:[#allocation3 + $0xb50] sm:$0xff]  ;;  %v977_v24 = vperm.slane %v544_v3, 4 }
 0x2c0   :  { %v1875_v25 = vmul.f32 %v975_v16, %v411_v19 }
 0x2c1   :  { %v2309_v32 = vadd.f32 %v2308_v28, %v1859_v23  ;;  %v412_v23 = vld [vmem:[#allocation3 + $0xb58] sm:$0xff]  ;;  %v978_v28 = vperm.slane %v544_v3, 5 }
 0x2c2   :  { %v1876_v29 = vmul.f32 %v976_v20, %v412_v23 }
 0x2c3   :  { %v2310_v37 = vadd.f32 %v2309_v32, %v1860_v27  ;;  %v413_v27 = vld [vmem:[#allocation3 + $0xb60] sm:$0xff]  ;;  %v979_v32 = vperm.slane %v544_v3, 6 }
 0x2c4   :  { %v1877_v33 = vmul.f32 %v977_v24, %v413_v27 }
 0x2c5   :  { %v2311_v41 = vadd.f32 %v2310_v37, %v1861_v31  ;;  %v414_v31 = vld [vmem:[#allocation3 + $0xb68] sm:$0xff]  ;;  %v980_v37 = vperm.slane %v544_v3, 7  ;;  %v1879_v42 = vmul.f32 %v979_v32, %v415_v35 }
 0x2c6   :  { %v1878_v38 = vmul.f32 %v978_v28, %v414_v31 }
 0x2c7   :  { %v2312_v45 = vadd.f32 %v2311_v41, %v1862_v36  ;;  %v545_v36 = vld [vmem:[#allocation5 + $0x170] sm:$0xff] }
 0x2c8   :  { %v981_v41 = vperm.slane %v545_v36, 0 }
 0x2c9   :  { %v2313_v49 = vadd.f32 %v2312_v45, %v1863_v40  ;;  %v416_v40 = vld [vmem:[#allocation3 + $0xb78] sm:$0xff]  ;;  %v982_v45 = vperm.slane %v545_v36, 1 }
 0x2ca   :  { %v1880_v46 = vmul.f32 %v980_v37, %v416_v40  ;;  %v431_v37 = vld [vmem:[#allocation3 + $0xbf0] sm:$0xff] }
 0x2cb   :  { %v2314_v53 = vadd.f32 %v2313_v49, %v1864_v44  ;;  %v417_v44 = vld [vmem:[#allocation3 + $0xb80] sm:$0xff]  ;;  %v983_v49 = vperm.slane %v545_v36, 2 }
 0x2cc   :  { %v1881_v50 = vmul.f32 %v981_v41, %v417_v44 }
 0x2cd   :  { %v2315_v57 = vadd.f32 %v2314_v53, %v1865_v48  ;;  %v418_v48 = vld [vmem:[#allocation3 + $0xb88] sm:$0xff]  ;;  %v984_v53 = vperm.slane %v545_v36, 3 }
 0x2ce   :  { %v1882_v54 = vmul.f32 %v982_v45, %v418_v48 }
 0x2cf   :  { %v2316_v61 = vadd.f32 %v2315_v57, %v1866_v52  ;;  %v419_v52 = vld [vmem:[#allocation3 + $0xb90] sm:$0xff]  ;;  %v985_v57 = vperm.slane %v545_v36, 4 }
 0x2d0   :  { %v1883_v58 = vmul.f32 %v983_v49, %v419_v52 }
 0x2d1   :  { %v2317_v1 = vadd.f32 %v2316_v61, %v1867_v56  ;;  %v420_v56 = vld [vmem:[#allocation3 + $0xb98] sm:$0xff]  ;;  %v986_v61 = vperm.slane %v545_v36, 5 }
 0x2d2   :  { %v1884_v62 = vmul.f32 %v984_v53, %v420_v56 }
 0x2d3   :  { %v2318_v6 = vadd.f32 %v2317_v1, %v1868_v60  ;;  %v421_v60 = vld [vmem:[#allocation3 + $0xba0] sm:$0xff]  ;;  %v987_v1 = vperm.slane %v545_v36, 6 }
 0x2d4   :  { %v1885_v2 = vmul.f32 %v985_v57, %v421_v60 }
 0x2d5   :  { %v2319_v10 = vadd.f32 %v2318_v6, %v1869_v0  ;;  %v422_v0 = vld [vmem:[#allocation3 + $0xba8] sm:$0xff]  ;;  %v988_v6 = vperm.slane %v545_v36, 7  ;;  %v1887_v11 = vmul.f32 %v987_v1, %v423_v4 }
 0x2d6   :  { %v1886_v7 = vmul.f32 %v986_v61, %v422_v0 }
 0x2d7   :  { %v2320_v14 = vadd.f32 %v2319_v10, %v1870_v5  ;;  %v546_v5 = vld [vmem:[#allocation5 + $0x178] sm:$0xff] }
 0x2d8   :  { %v989_v10 = vperm.slane %v546_v5, 0 }
 0x2d9   :  { %v2321_v18 = vadd.f32 %v2320_v14, %v1871_v9  ;;  %v424_v9 = vld [vmem:[#allocation3 + $0xbb8] sm:$0xff]  ;;  %v990_v14 = vperm.slane %v546_v5, 1 }
 0x2da   :  { %v1888_v15 = vmul.f32 %v988_v6, %v424_v9  ;;  %v439_v6 = vld [vmem:[#allocation3 + $0xc30] sm:$0xff] }
 0x2db   :  { %v2322_v22 = vadd.f32 %v2321_v18, %v1872_v13  ;;  %v425_v13 = vld [vmem:[#allocation3 + $0xbc0] sm:$0xff]  ;;  %v991_v18 = vperm.slane %v546_v5, 2 }
 0x2dc   :  { %v1889_v19 = vmul.f32 %v989_v10, %v425_v13 }
 0x2dd   :  { %v2323_v26 = vadd.f32 %v2322_v22, %v1873_v17  ;;  %v426_v17 = vld [vmem:[#allocation3 + $0xbc8] sm:$0xff]  ;;  %v992_v22 = vperm.slane %v546_v5, 3 }
 0x2de   :  { %v1890_v23 = vmul.f32 %v990_v14, %v426_v17 }
 0x2df   :  { %v2324_v30 = vadd.f32 %v2323_v26, %v1874_v21  ;;  %v427_v21 = vld [vmem:[#allocation3 + $0xbd0] sm:$0xff]  ;;  %v993_v26 = vperm.slane %v546_v5, 4 }
 0x2e0   :  { %v1891_v27 = vmul.f32 %v991_v18, %v427_v21 }
 0x2e1   :  { %v2325_v34 = vadd.f32 %v2324_v30, %v1875_v25  ;;  %v428_v25 = vld [vmem:[#allocation3 + $0xbd8] sm:$0xff]  ;;  %v994_v30 = vperm.slane %v546_v5, 5 }
 0x2e2   :  { %v1892_v31 = vmul.f32 %v992_v22, %v428_v25 }
 0x2e3   :  { %v2326_v39 = vadd.f32 %v2325_v34, %v1876_v29  ;;  %v429_v29 = vld [vmem:[#allocation3 + $0xbe0] sm:$0xff]  ;;  %v995_v34 = vperm.slane %v546_v5, 6 }
 0x2e4   :  { %v1893_v35 = vmul.f32 %v993_v26, %v429_v29 }
 0x2e5   :  { %v2327_v43 = vadd.f32 %v2326_v39, %v1877_v33  ;;  %v430_v33 = vld [vmem:[#allocation3 + $0xbe8] sm:$0xff]  ;;  %v996_v39 = vperm.slane %v546_v5, 7  ;;  %v1895_v44 = vmul.f32 %v995_v34, %v431_v37 }
 0x2e6   :  { %v1894_v40 = vmul.f32 %v994_v30, %v430_v33 }
 0x2e7   :  { %v2328_v47 = vadd.f32 %v2327_v43, %v1878_v38  ;;  %v547_v38 = vld [vmem:[#allocation5 + $0x180] sm:$0xff] }
 0x2e8   :  { %v997_v43 = vperm.slane %v547_v38, 0 }
 0x2e9   :  { %v2329_v51 = vadd.f32 %v2328_v47, %v1879_v42  ;;  %v432_v42 = vld [vmem:[#allocation3 + $0xbf8] sm:$0xff]  ;;  %v998_v47 = vperm.slane %v547_v38, 1 }
 0x2ea   :  { %v1896_v48 = vmul.f32 %v996_v39, %v432_v42  ;;  %v447_v39 = vld [vmem:[#allocation3 + $0xc70] sm:$0xff] }
 0x2eb   :  { %v2330_v55 = vadd.f32 %v2329_v51, %v1880_v46  ;;  %v433_v46 = vld [vmem:[#allocation3 + $0xc00] sm:$0xff]  ;;  %v999_v51 = vperm.slane %v547_v38, 2 }
 0x2ec   :  { %v1897_v52 = vmul.f32 %v997_v43, %v433_v46 }
 0x2ed   :  { %v2331_v59 = vadd.f32 %v2330_v55, %v1881_v50  ;;  %v434_v50 = vld [vmem:[#allocation3 + $0xc08] sm:$0xff]  ;;  %v1000_v55 = vperm.slane %v547_v38, 3 }
 0x2ee   :  { %v1898_v56 = vmul.f32 %v998_v47, %v434_v50 }
 0x2ef   :  { %v2332_v63 = vadd.f32 %v2331_v59, %v1882_v54  ;;  %v435_v54 = vld [vmem:[#allocation3 + $0xc10] sm:$0xff]  ;;  %v1001_v59 = vperm.slane %v547_v38, 4 }
 0x2f0   :  { %v1899_v60 = vmul.f32 %v999_v51, %v435_v54 }
 0x2f1   :  { %v2333_v3 = vadd.f32 %v2332_v63, %v1883_v58  ;;  %v436_v58 = vld [vmem:[#allocation3 + $0xc18] sm:$0xff]  ;;  %v1002_v63 = vperm.slane %v547_v38, 5 }
 0x2f2   :  { %v1900_v0 = vmul.f32 %v1000_v55, %v436_v58 }
 0x2f3   :  { %v2334_v8 = vadd.f32 %v2333_v3, %v1884_v62  ;;  %v437_v62 = vld [vmem:[#allocation3 + $0xc20] sm:$0xff]  ;;  %v1003_v3 = vperm.slane %v547_v38, 6 }
 0x2f4   :  { %v1901_v4 = vmul.f32 %v1001_v59, %v437_v62 }
 0x2f5   :  { %v2335_v12 = vadd.f32 %v2334_v8, %v1885_v2  ;;  %v438_v2 = vld [vmem:[#allocation3 + $0xc28] sm:$0xff]  ;;  %v1004_v8 = vperm.slane %v547_v38, 7  ;;  %v1903_v13 = vmul.f32 %v1003_v3, %v439_v6 }
 0x2f6   :  { %v1902_v9 = vmul.f32 %v1002_v63, %v438_v2 }
 0x2f7   :  { %v2336_v16 = vadd.f32 %v2335_v12, %v1886_v7  ;;  %v548_v7 = vld [vmem:[#allocation5 + $0x188] sm:$0xff] }
 0x2f8   :  { %v1005_v12 = vperm.slane %v548_v7, 0 }
 0x2f9   :  { %v2337_v20 = vadd.f32 %v2336_v16, %v1887_v11  ;;  %v440_v11 = vld [vmem:[#allocation3 + $0xc38] sm:$0xff]  ;;  %v1006_v16 = vperm.slane %v548_v7, 1 }
 0x2fa   :  { %v1904_v17 = vmul.f32 %v1004_v8, %v440_v11  ;;  %v455_v8 = vld [vmem:[#allocation3 + $0xcb0] sm:$0xff] }
 0x2fb   :  { %v2338_v24 = vadd.f32 %v2337_v20, %v1888_v15  ;;  %v441_v15 = vld [vmem:[#allocation3 + $0xc40] sm:$0xff]  ;;  %v1007_v20 = vperm.slane %v548_v7, 2 }
 0x2fc   :  { %v1905_v21 = vmul.f32 %v1005_v12, %v441_v15 }
 0x2fd   :  { %v2339_v28 = vadd.f32 %v2338_v24, %v1889_v19  ;;  %v442_v19 = vld [vmem:[#allocation3 + $0xc48] sm:$0xff]  ;;  %v1008_v24 = vperm.slane %v548_v7, 3 }
 0x2fe   :  { %v1906_v25 = vmul.f32 %v1006_v16, %v442_v19 }
 0x2ff   :  { %v2340_v32 = vadd.f32 %v2339_v28, %v1890_v23  ;;  %v443_v23 = vld [vmem:[#allocation3 + $0xc50] sm:$0xff]  ;;  %v1009_v28 = vperm.slane %v548_v7, 4 }
 0x300   :  { %v1907_v29 = vmul.f32 %v1007_v20, %v443_v23 }
 0x301   :  { %v2341_v36 = vadd.f32 %v2340_v32, %v1891_v27  ;;  %v444_v27 = vld [vmem:[#allocation3 + $0xc58] sm:$0xff]  ;;  %v1010_v32 = vperm.slane %v548_v7, 5 }
 0x302   :  { %v1908_v33 = vmul.f32 %v1008_v24, %v444_v27 }
 0x303   :  { %v2342_v41 = vadd.f32 %v2341_v36, %v1892_v31  ;;  %v445_v31 = vld [vmem:[#allocation3 + $0xc60] sm:$0xff]  ;;  %v1011_v36 = vperm.slane %v548_v7, 6 }
 0x304   :  { %v1909_v37 = vmul.f32 %v1009_v28, %v445_v31 }
 0x305   :  { %v2343_v45 = vadd.f32 %v2342_v41, %v1893_v35  ;;  %v446_v35 = vld [vmem:[#allocation3 + $0xc68] sm:$0xff]  ;;  %v1012_v41 = vperm.slane %v548_v7, 7  ;;  %v1911_v46 = vmul.f32 %v1011_v36, %v447_v39 }
 0x306   :  { %v1910_v42 = vmul.f32 %v1010_v32, %v446_v35 }
 0x307   :  { %v2344_v49 = vadd.f32 %v2343_v45, %v1894_v40  ;;  %v549_v40 = vld [vmem:[#allocation5 + $0x190] sm:$0xff] }
 0x308   :  { %v1013_v45 = vperm.slane %v549_v40, 0 }
 0x309   :  { %v2345_v53 = vadd.f32 %v2344_v49, %v1895_v44  ;;  %v448_v44 = vld [vmem:[#allocation3 + $0xc78] sm:$0xff]  ;;  %v1014_v49 = vperm.slane %v549_v40, 1 }
 0x30a   :  { %v1912_v50 = vmul.f32 %v1012_v41, %v448_v44  ;;  %v463_v41 = vld [vmem:[#allocation3 + $0xcf0] sm:$0xff] }
 0x30b   :  { %v2346_v57 = vadd.f32 %v2345_v53, %v1896_v48  ;;  %v449_v48 = vld [vmem:[#allocation3 + $0xc80] sm:$0xff]  ;;  %v1015_v53 = vperm.slane %v549_v40, 2 }
 0x30c   :  { %v1913_v54 = vmul.f32 %v1013_v45, %v449_v48 }
 0x30d   :  { %v2347_v61 = vadd.f32 %v2346_v57, %v1897_v52  ;;  %v450_v52 = vld [vmem:[#allocation3 + $0xc88] sm:$0xff]  ;;  %v1016_v57 = vperm.slane %v549_v40, 3 }
 0x30e   :  { %v1914_v58 = vmul.f32 %v1014_v49, %v450_v52 }
 0x30f   :  { %v2348_v1 = vadd.f32 %v2347_v61, %v1898_v56  ;;  %v451_v56 = vld [vmem:[#allocation3 + $0xc90] sm:$0xff]  ;;  %v1017_v61 = vperm.slane %v549_v40, 4 }
 0x310   :  { %v1915_v62 = vmul.f32 %v1015_v53, %v451_v56 }
 0x311   :  { %v2349_v5 = vadd.f32 %v2348_v1, %v1899_v60  ;;  %v452_v60 = vld [vmem:[#allocation3 + $0xc98] sm:$0xff]  ;;  %v1018_v1 = vperm.slane %v549_v40, 5 }
 0x312   :  { %v1916_v2 = vmul.f32 %v1016_v57, %v452_v60 }
 0x313   :  { %v2350_v10 = vadd.f32 %v2349_v5, %v1900_v0  ;;  %v453_v0 = vld [vmem:[#allocation3 + $0xca0] sm:$0xff]  ;;  %v1019_v5 = vperm.slane %v549_v40, 6 }
 0x314   :  { %v1917_v6 = vmul.f32 %v1017_v61, %v453_v0 }
 0x315   :  { %v2351_v14 = vadd.f32 %v2350_v10, %v1901_v4  ;;  %v454_v4 = vld [vmem:[#allocation3 + $0xca8] sm:$0xff]  ;;  %v1020_v10 = vperm.slane %v549_v40, 7  ;;  %v1919_v15 = vmul.f32 %v1019_v5, %v455_v8 }
 0x316   :  { %v1918_v11 = vmul.f32 %v1018_v1, %v454_v4 }
 0x317   :  { %v2352_v18 = vadd.f32 %v2351_v14, %v1902_v9  ;;  %v550_v9 = vld [vmem:[#allocation5 + $0x198] sm:$0xff] }
 0x318   :  { %v1021_v14 = vperm.slane %v550_v9, 0 }
 0x319   :  { %v2353_v22 = vadd.f32 %v2352_v18, %v1903_v13  ;;  %v456_v13 = vld [vmem:[#allocation3 + $0xcb8] sm:$0xff]  ;;  %v1022_v18 = vperm.slane %v550_v9, 1 }
 0x31a   :  { %v1920_v19 = vmul.f32 %v1020_v10, %v456_v13  ;;  %v471_v10 = vld [vmem:[#allocation3 + $0xd30] sm:$0xff] }
 0x31b   :  { %v2354_v26 = vadd.f32 %v2353_v22, %v1904_v17  ;;  %v457_v17 = vld [vmem:[#allocation3 + $0xcc0] sm:$0xff]  ;;  %v1023_v22 = vperm.slane %v550_v9, 2 }
 0x31c   :  { %v1921_v23 = vmul.f32 %v1021_v14, %v457_v17 }
 0x31d   :  { %v2355_v30 = vadd.f32 %v2354_v26, %v1905_v21  ;;  %v458_v21 = vld [vmem:[#allocation3 + $0xcc8] sm:$0xff]  ;;  %v1024_v26 = vperm.slane %v550_v9, 3 }
 0x31e   :  { %v1922_v27 = vmul.f32 %v1022_v18, %v458_v21 }
 0x31f   :  { %v2356_v34 = vadd.f32 %v2355_v30, %v1906_v25  ;;  %v459_v25 = vld [vmem:[#allocation3 + $0xcd0] sm:$0xff]  ;;  %v1025_v30 = vperm.slane %v550_v9, 4 }
 0x320   :  { %v1923_v31 = vmul.f32 %v1023_v22, %v459_v25 }
 0x321   :  { %v2357_v38 = vadd.f32 %v2356_v34, %v1907_v29  ;;  %v460_v29 = vld [vmem:[#allocation3 + $0xcd8] sm:$0xff]  ;;  %v1026_v34 = vperm.slane %v550_v9, 5 }
 0x322   :  { %v1924_v35 = vmul.f32 %v1024_v26, %v460_v29 }
 0x323   :  { %v2358_v43 = vadd.f32 %v2357_v38, %v1908_v33  ;;  %v461_v33 = vld [vmem:[#allocation3 + $0xce0] sm:$0xff]  ;;  %v1027_v38 = vperm.slane %v550_v9, 6 }
 0x324   :  { %v1925_v39 = vmul.f32 %v1025_v30, %v461_v33 }
 0x325   :  { %v2359_v47 = vadd.f32 %v2358_v43, %v1909_v37  ;;  %v462_v37 = vld [vmem:[#allocation3 + $0xce8] sm:$0xff]  ;;  %v1028_v43 = vperm.slane %v550_v9, 7  ;;  %v1927_v48 = vmul.f32 %v1027_v38, %v463_v41 }
 0x326   :  { %v1926_v44 = vmul.f32 %v1026_v34, %v462_v37 }
 0x327   :  { %v2360_v51 = vadd.f32 %v2359_v47, %v1910_v42  ;;  %v551_v42 = vld [vmem:[#allocation5 + $0x1a0] sm:$0xff] }
 0x328   :  { %v1029_v47 = vperm.slane %v551_v42, 0 }
 0x329   :  { %v2361_v55 = vadd.f32 %v2360_v51, %v1911_v46  ;;  %v464_v46 = vld [vmem:[#allocation3 + $0xcf8] sm:$0xff]  ;;  %v1030_v51 = vperm.slane %v551_v42, 1 }
 0x32a   :  { %v1928_v52 = vmul.f32 %v1028_v43, %v464_v46  ;;  %v479_v43 = vld [vmem:[#allocation3 + $0xd70] sm:$0xff] }
 0x32b   :  { %v2362_v59 = vadd.f32 %v2361_v55, %v1912_v50  ;;  %v465_v50 = vld [vmem:[#allocation3 + $0xd00] sm:$0xff]  ;;  %v1031_v55 = vperm.slane %v551_v42, 2 }
 0x32c   :  { %v1929_v56 = vmul.f32 %v1029_v47, %v465_v50 }
 0x32d   :  { %v2363_v63 = vadd.f32 %v2362_v59, %v1913_v54  ;;  %v466_v54 = vld [vmem:[#allocation3 + $0xd08] sm:$0xff]  ;;  %v1032_v59 = vperm.slane %v551_v42, 3 }
 0x32e   :  { %v1930_v60 = vmul.f32 %v1030_v51, %v466_v54 }
 0x32f   :  { %v2364_v3 = vadd.f32 %v2363_v63, %v1914_v58  ;;  %v467_v58 = vld [vmem:[#allocation3 + $0xd10] sm:$0xff]  ;;  %v1033_v63 = vperm.slane %v551_v42, 4 }
 0x330   :  { %v1931_v0 = vmul.f32 %v1031_v55, %v467_v58 }
 0x331   :  { %v2365_v7 = vadd.f32 %v2364_v3, %v1915_v62  ;;  %v468_v62 = vld [vmem:[#allocation3 + $0xd18] sm:$0xff]  ;;  %v1034_v3 = vperm.slane %v551_v42, 5 }
 0x332   :  { %v1932_v4 = vmul.f32 %v1032_v59, %v468_v62 }
 0x333   :  { %v2366_v12 = vadd.f32 %v2365_v7, %v1916_v2  ;;  %v469_v2 = vld [vmem:[#allocation3 + $0xd20] sm:$0xff]  ;;  %v1035_v7 = vperm.slane %v551_v42, 6 }
 0x334   :  { %v1933_v8 = vmul.f32 %v1033_v63, %v469_v2 }
 0x335   :  { %v2367_v16 = vadd.f32 %v2366_v12, %v1917_v6  ;;  %v470_v6 = vld [vmem:[#allocation3 + $0xd28] sm:$0xff]  ;;  %v1036_v12 = vperm.slane %v551_v42, 7  ;;  %v1935_v17 = vmul.f32 %v1035_v7, %v471_v10 }
 0x336   :  { %v1934_v13 = vmul.f32 %v1034_v3, %v470_v6 }
 0x337   :  { %v2368_v20 = vadd.f32 %v2367_v16, %v1918_v11  ;;  %v552_v11 = vld [vmem:[#allocation5 + $0x1a8] sm:$0xff] }
 0x338   :  { %v1037_v16 = vperm.slane %v552_v11, 0 }
 0x339   :  { %v2369_v24 = vadd.f32 %v2368_v20, %v1919_v15  ;;  %v472_v15 = vld [vmem:[#allocation3 + $0xd38] sm:$0xff]  ;;  %v1038_v20 = vperm.slane %v552_v11, 1 }
 0x33a   :  { %v1936_v21 = vmul.f32 %v1036_v12, %v472_v15  ;;  %v487_v12 = vld [vmem:[#allocation3 + $0xdb0] sm:$0xff] }
 0x33b   :  { %v2370_v28 = vadd.f32 %v2369_v24, %v1920_v19  ;;  %v473_v19 = vld [vmem:[#allocation3 + $0xd40] sm:$0xff]  ;;  %v1039_v24 = vperm.slane %v552_v11, 2 }
 0x33c   :  { %v1937_v25 = vmul.f32 %v1037_v16, %v473_v19 }
 0x33d   :  { %v2371_v32 = vadd.f32 %v2370_v28, %v1921_v23  ;;  %v474_v23 = vld [vmem:[#allocation3 + $0xd48] sm:$0xff]  ;;  %v1040_v28 = vperm.slane %v552_v11, 3 }
 0x33e   :  { %v1938_v29 = vmul.f32 %v1038_v20, %v474_v23 }
 0x33f   :  { %v2372_v36 = vadd.f32 %v2371_v32, %v1922_v27  ;;  %v475_v27 = vld [vmem:[#allocation3 + $0xd50] sm:$0xff]  ;;  %v1041_v32 = vperm.slane %v552_v11, 4 }
 0x340   :  { %v1939_v33 = vmul.f32 %v1039_v24, %v475_v27 }
 0x341   :  { %v2373_v40 = vadd.f32 %v2372_v36, %v1923_v31  ;;  %v476_v31 = vld [vmem:[#allocation3 + $0xd58] sm:$0xff]  ;;  %v1042_v36 = vperm.slane %v552_v11, 5 }
 0x342   :  { %v1940_v37 = vmul.f32 %v1040_v28, %v476_v31 }
 0x343   :  { %v2374_v45 = vadd.f32 %v2373_v40, %v1924_v35  ;;  %v477_v35 = vld [vmem:[#allocation3 + $0xd60] sm:$0xff]  ;;  %v1043_v40 = vperm.slane %v552_v11, 6 }
 0x344   :  { %v1941_v41 = vmul.f32 %v1041_v32, %v477_v35 }
 0x345   :  { %v2375_v49 = vadd.f32 %v2374_v45, %v1925_v39  ;;  %v478_v39 = vld [vmem:[#allocation3 + $0xd68] sm:$0xff]  ;;  %v1044_v45 = vperm.slane %v552_v11, 7  ;;  %v1943_v50 = vmul.f32 %v1043_v40, %v479_v43 }
 0x346   :  { %v1942_v46 = vmul.f32 %v1042_v36, %v478_v39 }
 0x347   :  { %v2376_v53 = vadd.f32 %v2375_v49, %v1926_v44  ;;  %v553_v44 = vld [vmem:[#allocation5 + $0x1b0] sm:$0xff] }
 0x348   :  { %v1045_v49 = vperm.slane %v553_v44, 0 }
 0x349   :  { %v2377_v57 = vadd.f32 %v2376_v53, %v1927_v48  ;;  %v480_v48 = vld [vmem:[#allocation3 + $0xd78] sm:$0xff]  ;;  %v1046_v53 = vperm.slane %v553_v44, 1 }
 0x34a   :  { %v1944_v54 = vmul.f32 %v1044_v45, %v480_v48  ;;  %v495_v45 = vld [vmem:[#allocation3 + $0xdf0] sm:$0xff] }
 0x34b   :  { %v2378_v61 = vadd.f32 %v2377_v57, %v1928_v52  ;;  %v481_v52 = vld [vmem:[#allocation3 + $0xd80] sm:$0xff]  ;;  %v1047_v57 = vperm.slane %v553_v44, 2 }
 0x34c   :  { %v1945_v58 = vmul.f32 %v1045_v49, %v481_v52 }
 0x34d   :  { %v2379_v1 = vadd.f32 %v2378_v61, %v1929_v56  ;;  %v482_v56 = vld [vmem:[#allocation3 + $0xd88] sm:$0xff]  ;;  %v1048_v61 = vperm.slane %v553_v44, 3 }
 0x34e   :  { %v1946_v62 = vmul.f32 %v1046_v53, %v482_v56 }
 0x34f   :  { %v2380_v5 = vadd.f32 %v2379_v1, %v1930_v60  ;;  %v483_v60 = vld [vmem:[#allocation3 + $0xd90] sm:$0xff]  ;;  %v1049_v1 = vperm.slane %v553_v44, 4 }
 0x350   :  { %v1947_v2 = vmul.f32 %v1047_v57, %v483_v60 }
 0x351   :  { %v2381_v9 = vadd.f32 %v2380_v5, %v1931_v0  ;;  %v484_v0 = vld [vmem:[#allocation3 + $0xd98] sm:$0xff]  ;;  %v1050_v5 = vperm.slane %v553_v44, 5 }
 0x352   :  { %v1948_v6 = vmul.f32 %v1048_v61, %v484_v0 }
 0x353   :  { %v2382_v14 = vadd.f32 %v2381_v9, %v1932_v4  ;;  %v485_v4 = vld [vmem:[#allocation3 + $0xda0] sm:$0xff]  ;;  %v1051_v9 = vperm.slane %v553_v44, 6 }
 0x354   :  { %v1949_v10 = vmul.f32 %v1049_v1, %v485_v4  ;;  %v1963_v1 = vld [vmem:[%s2540_s3] sm:$0xff]  ;;  %v2423_v4 = vstv %s2539_s2 }
 0x355   :  { %v2383_v18 = vadd.f32 %v2382_v14, %v1933_v8  ;;  %v486_v8 = vld [vmem:[#allocation3 + $0xda8] sm:$0xff]  ;;  %v1052_v14 = vperm.slane %v553_v44, 7  ;;  %v1951_v19 = vmul.f32 %v1051_v9, %v487_v12 }
 0x356   :  { %v1950_v15 = vmul.f32 %v1050_v5, %v486_v8 }
 0x357   :  { %v2384_v22 = vadd.f32 %v2383_v18, %v1934_v13  ;;  %v554_v13 = vld [vmem:[#allocation5 + $0x1b8] sm:$0xff] }
 0x358   :  { %v1053_v18 = vperm.slane %v554_v13, 0 }
 0x359   :  { %v2385_v26 = vadd.f32 %v2384_v22, %v1935_v17  ;;  %v488_v17 = vld [vmem:[#allocation3 + $0xdb8] sm:$0xff]  ;;  %v1054_v22 = vperm.slane %v554_v13, 1 }
 0x35a   :  { %v1952_v23 = vmul.f32 %v1052_v14, %v488_v17 }
 0x35b   :  { %v2386_v30 = vadd.f32 %v2385_v26, %v1936_v21  ;;  %v489_v21 = vld [vmem:[#allocation3 + $0xdc0] sm:$0xff]  ;;  %v1055_v26 = vperm.slane %v554_v13, 2 }
 0x35c   :  { %v1953_v27 = vmul.f32 %v1053_v18, %v489_v21 }
 0x35d   :  { %v2387_v34 = vadd.f32 %v2386_v30, %v1937_v25  ;;  %v490_v25 = vld [vmem:[#allocation3 + $0xdc8] sm:$0xff]  ;;  %v1056_v30 = vperm.slane %v554_v13, 3 }
 0x35e   :  { %v1954_v31 = vmul.f32 %v1054_v22, %v490_v25 }
 0x35f   :  { %v2388_v38 = vadd.f32 %v2387_v34, %v1938_v29  ;;  %v491_v29 = vld [vmem:[#allocation3 + $0xdd0] sm:$0xff]  ;;  %v1057_v34 = vperm.slane %v554_v13, 4 }
 0x360   :  { %v1955_v35 = vmul.f32 %v1055_v26, %v491_v29 }
 0x361   :  { %v2389_v42 = vadd.f32 %v2388_v38, %v1939_v33  ;;  %v492_v33 = vld [vmem:[#allocation3 + $0xdd8] sm:$0xff]  ;;  %v1058_v38 = vperm.slane %v554_v13, 5 }
 0x362   :  { %v1956_v39 = vmul.f32 %v1056_v30, %v492_v33 }
 0x363   :  { %v2390_v47 = vadd.f32 %v2389_v42, %v1940_v37  ;;  %v493_v37 = vld [vmem:[#allocation3 + $0xde0] sm:$0xff]  ;;  %v1059_v42 = vperm.slane %v554_v13, 6 }
 0x364   :  { %v1957_v43 = vmul.f32 %v1057_v34, %v493_v37 }
 0x365   :  { %v2391_v51 = vadd.f32 %v2390_v47, %v1941_v41  ;;  %v494_v41 = vld [vmem:[#allocation3 + $0xde8] sm:$0xff]  ;;  %v1060_v47 = vperm.slane %v554_v13, 7  ;;  %v1959_v52 = vmul.f32 %v1059_v42, %v495_v45 }
 0x366   :  { %v1958_v48 = vmul.f32 %v1058_v38, %v494_v41 }
 0x367   :  { %v2392_v55 = vadd.f32 %v2391_v51, %v1942_v46  ;;  %v555_v46 = vld [vmem:[#allocation5 + $0x1c0] sm:$0x3] }
 0x368   :  { %v1061_v51 = vperm.slane %v555_v46, 0 }
 0x369   :  { %v2393_v59 = vadd.f32 %v2392_v55, %v1943_v50  ;;  %v496_v50 = vld [vmem:[#allocation3 + $0xdf8] sm:$0xff]  ;;  %v1062_v55 = vperm.slane %v555_v46, 1 }
 0x36a   :  { %v1960_v56 = vmul.f32 %v1060_v47, %v496_v50 }
 0x36b   :  { %v2394_v63 = vadd.f32 %v2393_v59, %v1944_v54  ;;  %v497_v54 = vld [vmem:[#allocation3 + $0xe00] sm:$0xff] }
 0x36c   :  { %v1961_v59 = vmul.f32 %v1061_v51, %v497_v54 }
 0x36d   :  { %v2395_v3 = vadd.f32 %v2394_v63, %v1945_v58  ;;  %v498_v58 = vld [vmem:[#allocation3 + $0xe08] sm:$0xff] }
 0x36e   :  { %v1962_v61 = vmul.f32 %v1062_v55, %v498_v58 }
 0x36f   :  { %v2396_v7 = vadd.f32 %v2395_v3, %v1946_v62 }
 0x371   :  { %v2397_v11 = vadd.f32 %v2396_v7, %v1947_v2 }
 0x373   :  { %v2398_v16 = vadd.f32 %v2397_v11, %v1948_v6 }
 0x375   :  { %v2399_v20 = vadd.f32 %v2398_v16, %v1949_v10 }
 0x377   :  { %v2400_v24 = vadd.f32 %v2399_v20, %v1950_v15 }
 0x379   :  { %v2401_v28 = vadd.f32 %v2400_v24, %v1951_v19 }
 0x37b   :  { %v2402_v32 = vadd.f32 %v2401_v28, %v1952_v23 }
 0x37d   :  { %v2403_v36 = vadd.f32 %v2402_v32, %v1953_v27 }
 0x37f   :  { %v2404_v40 = vadd.f32 %v2403_v36, %v1954_v31 }
 0x381   :  { %v2405_v44 = vadd.f32 %v2404_v40, %v1955_v35 }
 0x383   :  { %v2406_v49 = vadd.f32 %v2405_v44, %v1956_v39 }
 0x385   :  { %v2407_v53 = vadd.f32 %v2406_v49, %v1957_v43 }
 0x387   :  { %v2408_v57 = vadd.f32 %v2407_v53, %v1958_v48 }
 0x389   :  { %v2409_v60 = vadd.f32 %v2408_v57, %v1959_v52 }
 0x38b   :  { %v2410_v62 = vadd.f32 %v2409_v60, %v1960_v56 }
 0x38d   :  { %v2411_v63 = vadd.f32 %v2410_v62, %v1961_v59 }
 0x38f   :  { %v2412_v0 = vadd.f32 %v2411_v63, %v1962_v61 }
 0x391   :  { %2413 = vadd.xlane.f32.xlu0 %v2412_v0 }
 0x404   :  { %v2414_v2 = vpop.xlane.xlu0 %2413 }
 0x405   :  { %v2415_v3 = vadd.f32 %v2414_v2, %v1963_v1 }
 0x407   :  { %2417 = vst.msk [vmem:[%s2540_s3] sm:$0xff] %vm47_vm0, %v2415_v3 }
 0x40e   :  { %v2421_v5 = vld [vmem:[%s2540_s3] sm:$0xff] }
 0x40f   :  { %v2424_v6 = vadd.f32 %v2423_v4, %v2421_v5 }
 0x411   :  { %2425 = vst.msk [vmem:[%s2540_s3] sm:$0xff] %vm47_vm0, %v2424_v6 }
 0x412   :  { %2430 = vsyncpa [#allocation4], 1 }
 0x413   :  { %2431 = vsyncpa [#allocation6], 1 }

</bundles_post_ra>
